<compile_context>
chip_gen: v6e
topology: v6e:2x2x1
jax: 0.10.0
libtpu: 0.0.40
codegen_flags: <defaults>
</compile_context>

<pallas_src>
import jax
import jax.numpy as jnp
from jax.experimental import pallas as pl
from jax.experimental.pallas import tpu as pltpu

# Problem-size constants implied by the module (Linear(960, 256) => L = 30).
L_IN = 30      # input sequence length
C_IN = 14      # input channels
K1 = 5         # conv1 kernel size
L_OUT = 15     # sequence length after the stride-2 conv
C1 = 16        # conv1 output channels
C2 = 64        # conv2 output channels
D_FLAT = L_OUT * C2   # 960
H_FC = 256
BN_EPS = 1e-5


# ----------------------------------------------------------------------------
# Fused Pallas kernel: conv1+BN+ReLU -> conv2+BN+ReLU -> flatten -> fc1 -> fc2 -> reg
# ----------------------------------------------------------------------------
def _fused_cnn_a_kernel(xcol_ref, w1_ref, shift1_ref, w2_ref, shift2_ref,
                        wf1_hbm_ref, bf1_ref, wf2_hbm_ref, bf2_ref, wr_ref, br_ref,
                        out_ref,
                        wf1_vmem, wf2_vmem, h1pad_s, flat_s, dma_sem):
    f32 = jnp.float32
    batch = out_ref.shape[0]
    rows = L_OUT * batch                     # activation rows, ordered (l, b)

    # Kick off the two big fc-weight DMAs first; the conv work below hides them.
    wf1_cp = pltpu.make_async_copy(wf1_hbm_ref, wf1_vmem, dma_sem.at[0])
    wf2_cp = pltpu.make_async_copy(wf2_hbm_ref, wf2_vmem, dma_sem.at[1])
    wf1_cp.start()
    wf2_cp.start()

    # Zero only the two boundary row-blocks of the padded-h1 scratch
    # (positions -1 and 15); everything in between is overwritten below.
    zero_blk = jnp.zeros((batch, C1), dtype=h1pad_s.dtype)
    h1pad_s[pl.ds(0, batch), :] = zero_blk
    h1pad_s[pl.ds((L_OUT + 1) * batch, batch), :] = zero_blk

    # ---- conv1 (k=5, s=2, p=2) + BN + ReLU: ONE K=70 matmul over im2col ----
    acc1 = jnp.dot(xcol_ref[...], w1_ref[...], preferred_element_type=f32)
    h1 = jnp.maximum(acc1 + shift1_ref[...], 0.0).astype(h1pad_s.dtype)  # (rows, 16)

    # ---- conv2 (k=3, s=1, p=1) + BN + ReLU: 3 batched (rows,16)x(16,64) ----
    # Shifted operands come from one padded scratch store; the center tap uses
    # the register value directly (no reload).
    h1pad_s[pl.ds(batch, rows), :] = h1
    w2 = w2_ref[...]
    acc2 = jnp.dot(h1pad_s[pl.ds(0, rows), :], w2[0],
                   preferred_element_type=f32)              # position l-1
    acc2 += jnp.dot(h1, w2[1], preferred_element_type=f32)  # position l
    acc2 += jnp.dot(h1pad_s[pl.ds(2 * batch, rows), :], w2[2],
                    preferred_element_type=f32)             # position l+1
    h2 = jnp.maximum(acc2 + shift2_ref[...], 0.0).astype(flat_s.dtype)   # (rows, 64)

    # ---- position-major flatten: one batched (batch, 64) store per position.
    # (fc1's weight rows were permuted offline to match flat[b, l*64 + c].)
    for l in range(L_OUT):
        flat_s[:, pl.ds(l * C2, C2)] = h2[l * batch:(l + 1) * batch, :]

    # ---- MLP: fc1 -> ReLU -> (dropout=id) -> fc2 -> ReLU -> (dropout=id) -> reg
    wf1_cp.wait()   # conv work above hid most of this ~480 KB DMA
    h = jnp.dot(flat_s[...], wf1_vmem[...], preferred_element_type=f32) + bf1_ref[...]
    h = jnp.maximum(h, 0.0).astype(jnp.bfloat16)
    wf2_cp.wait()
    h = jnp.dot(h, wf2_vmem[...], preferred_element_type=f32) + bf2_ref[...]
    h = jnp.maximum(h, 0.0).astype(jnp.bfloat16)
    out_ref[...] = jnp.dot(h, wr_ref[...], preferred_element_type=f32) + br_ref[...]


def _full_spec(shape):
    return pl.BlockSpec(shape, lambda i, _n=len(shape): (0,) * _n)


def _im2col_conv1(x):
    """(B, 30, 14) f32 -> position-major conv1 patches (15*B, 70) bf16."""
    B = x.shape[0]
    xpad = jnp.pad(x, ((0, 0), (2, 2), (0, 0)))                       # (B, 34, 14)
    idx = 2 * jnp.arange(L_OUT)[:, None] + jnp.arange(K1)[None, :]    # (15, 5)
    win = xpad[:, idx, :]                                             # (B, 15, 5, 14)
    xcol = win.reshape(B, L_OUT, K1 * C_IN).transpose(1, 0, 2)        # (15, B, 70)
    return xcol.reshape(L_OUT * B, K1 * C_IN).astype(jnp.bfloat16)    # row = l*B + b


def cnn_a_forward(kparams, x):
    """x: (B, L=30, C=14) float32 -> (B, 1) float32."""
    B, L, C = x.shape
    assert L == L_IN and C == C_IN

    # Tiny (~4 KB) im2col done by XLA in the producer fusion so conv1 becomes a
    # single K=70 MXU matmul in-kernel.
    xcol = _im2col_conv1(x)
    kp = kparams

    flops = (2 * B * L_OUT * (K1 * C_IN * C1 + 3 * C1 * C2)
             + 2 * B * (D_FLAT * H_FC + H_FC * H_FC + H_FC))
    bytes_accessed = (
        L_OUT * B * K1 * C_IN * 2                                        # xcol
        + (K1 * C_IN * C1 + 3 * C1 * C2 + D_FLAT * H_FC + H_FC * H_FC + H_FC) * 2  # weights
        + (C1 + C2 + 2 * H_FC + 1) * 4                                   # shifts / biases
        + B * 4)                                                         # output

    return pl.pallas_call(
        _fused_cnn_a_kernel,
        out_shape=jax.ShapeDtypeStruct((B, 1), jnp.float32),
        grid=(1,),  # single step; add a 'parallel' batch-tile axis if B grows (v7x 2nd TC)
        in_specs=[
            _full_spec((L_OUT * B, K1 * C_IN)),     # xcol (im2col'd input, bf16)
            _full_spec((K1 * C_IN, C1)),            # conv1 weight (BN-folded, bf16)
            _full_spec((1, C1)),                    # shift1 (f32)
            _full_spec((3, C1, C2)),                # conv2 taps (BN-folded, bf16)
            _full_spec((1, C2)),                    # shift2 (f32)
            pl.BlockSpec(memory_space=pl.ANY),      # wf1 -> manual DMA in kernel
            _full_spec((1, H_FC)),                  # bf1
            pl.BlockSpec(memory_space=pl.ANY),      # wf2 -> manual DMA in kernel
            _full_spec((1, H_FC)),                  # bf2
            _full_spec((H_FC, 1)),                  # wr
            _full_spec((1, 1)),                     # br
        ],
        out_specs=_full_spec((B, 1)),
        scratch_shapes=[
            pltpu.VMEM((D_FLAT, H_FC), jnp.bfloat16),        # wf1 landing buffer
            pltpu.VMEM((H_FC, H_FC), jnp.bfloat16),          # wf2 landing buffer
            pltpu.VMEM(((L_OUT + 2) * B, C1), jnp.bfloat16), # zero-padded h1
            pltpu.VMEM((B, D_FLAT), jnp.bfloat16),           # flattened h2
            pltpu.SemaphoreType.DMA((2,)),
        ],
        compiler_params=pltpu.CompilerParams(
            dimension_semantics=("arbitrary",)),
        cost_estimate=pl.CostEstimate(flops=flops, transcendentals=0,
                                      bytes_accessed=bytes_accessed),
    )(xcol, kp["w1"], kp["shift1"], kp["w2"], kp["shift2"], kp["wf1"],
      kp["bf1"], kp["wf2"], kp["bf2"], kp["wr"], kp["br"])


# ----------------------------------------------------------------------------
# Parameter construction (PyTorch-like layouts) and offline kernel prep
# ----------------------------------------------------------------------------
def init_torch_like_params(key):
    ks = jax.random.split(key, 18)
    s = 0.1
    p = {}
    p["conv1_w"] = s * jax.random.normal(ks[0], (C1, C_IN, K1), jnp.float32)  # (out,in,k)
    p["conv1_b"] = s * jax.random.normal(ks[1], (C1,), jnp.float32)
    p["bn1_gamma"] = 1.0 + s * jax.random.normal(ks[2], (C1,), jnp.float32)
    p["bn1_beta"] = s * jax.random.normal(ks[3], (C1,), jnp.float32)
    p["bn1_mean"] = s * jax.random.normal(ks[4], (C1,), jnp.float32)
    p["bn1_var"] = jnp.abs(1.0 + s * jax.random.normal(ks[5], (C1,), jnp.float32))
    p["conv2_w"] = s * jax.random.normal(ks[6], (C2, C1, 3), jnp.float32)
    p["conv2_b"] = s * jax.random.normal(ks[7], (C2,), jnp.float32)
    p["bn2_gamma"] = 1.0 + s * jax.random.normal(ks[8], (C2,), jnp.float32)
    p["bn2_beta"] = s * jax.random.normal(ks[9], (C2,), jnp.float32)
    p["bn2_mean"] = s * jax.random.normal(ks[10], (C2,), jnp.float32)
    p["bn2_var"] = jnp.abs(1.0 + s * jax.random.normal(ks[11], (C2,), jnp.float32))
    p["fc1_w"] = s * jax.random.normal(ks[12], (H_FC, D_FLAT), jnp.float32)  # (out,in)
    p["fc1_b"] = s * jax.random.normal(ks[13], (H_FC,), jnp.float32)
    p["fc2_w"] = s * jax.random.normal(ks[14], (H_FC, H_FC), jnp.float32)
    p["fc2_b"] = s * jax.random.normal(ks[15], (H_FC,), jnp.float32)
    p["reg_w"] = s * jax.random.normal(ks[16], (1, H_FC), jnp.float32)
    p["reg_b"] = s * jax.random.normal(ks[17], (1,), jnp.float32)
    return p


def prepare_kernel_params(tp, eps=BN_EPS):
    """Fold BN, build the (70,16) conv1 matrix, permute fc1 rows, cast to bf16."""
    kp = {}
    s1 = tp["bn1_gamma"] / jnp.sqrt(tp["bn1_var"] + eps)                # (16,)
    w1 = jnp.transpose(tp["conv1_w"], (2, 1, 0)) * s1[None, None, :]    # (5, 14, 16)
    kp["w1"] = w1.reshape(K1 * C_IN, C1).astype(jnp.bfloat16)           # row = k*14 + j
    kp["shift1"] = (tp["bn1_beta"] + (tp["conv1_b"] - tp["bn1_mean"]) * s1)[None, :]

    s2 = tp["bn2_gamma"] / jnp.sqrt(tp["bn2_var"] + eps)                # (64,)
    w2 = jnp.transpose(tp["conv2_w"], (2, 1, 0)) * s2[None, None, :]    # (3, 16, 64)
    kp["w2"] = w2.astype(jnp.bfloat16)
    kp["shift2"] = (tp["bn2_beta"] + (tp["conv2_b"] - tp["bn2_mean"]) * s2)[None, :]

    # fc1: (out,in) -> (in,out), and absorb PyTorch's channel-major flatten
    # (old row = c*L_OUT + l) into the kernel's position-major flatten
    # (new row = l*C2 + c) via a static row permutation.
    perm = (jnp.arange(C2)[None, :] * L_OUT + jnp.arange(L_OUT)[:, None]).reshape(-1)
    kp["wf1"] = tp["fc1_w"].T[perm, :].astype(jnp.bfloat16)             # (960, 256)
    kp["bf1"] = tp["fc1_b"][None, :]
    kp["wf2"] = tp["fc2_w"].T.astype(jnp.bfloat16)                      # (256, 256)
    kp["bf2"] = tp["fc2_b"][None, :]
    kp["wr"] = tp["reg_w"].T.astype(jnp.bfloat16)                       # (256, 1)
    kp["br"] = tp["reg_b"][None, :]                                     # (1, 1)
    return kp


# ----------------------------------------------------------------------------
# Pure-JAX references for validation
# ----------------------------------------------------------------------------
def cnn_a_reference(tp, x, eps=BN_EPS):
    """f32 op-for-op emulation of the PyTorch module (eval mode)."""
    xc = jnp.transpose(x, (0, 2, 1))                                    # (B, 14, 30)
    y = jax.lax.conv_general_dilated(xc, tp["conv1_w"], window_strides=(2,),
                                     padding=((2, 2),),
                                     dimension_numbers=("NCH", "OIH", "NCH"))
    y = y + tp["conv1_b"][None, :, None]
    y = (y - tp["bn1_mean"][None, :, None]) / jnp.sqrt(tp["bn1_var"] + eps)[None, :, None]
    y = jnp.maximum(y * tp["bn1_gamma"][None, :, None] + tp["bn1_beta"][None, :, None], 0.0)
    y = jax.lax.conv_general_dilated(y, tp["conv2_w"], window_strides=(1,),
                                     padding=((1, 1),),
                                     dimension_numbers=("NCH", "OIH", "NCH"))
    y = y + tp["conv2_b"][None, :, None]
    y = (y - tp["bn2_mean"][None, :, None]) / jnp.sqrt(tp["bn2_var"] + eps)[None, :, None]
    y = jnp.maximum(y * tp["bn2_gamma"][None, :, None] + tp["bn2_beta"][None, :, None], 0.0)
    flat = y.reshape(y.shape[0], -1)                                    # channel-major (B, 960)
    h = jnp.maximum(flat @ tp["fc1_w"].T + tp["fc1_b"], 0.0)
    h = jnp.maximum(h @ tp["fc2_w"].T + tp["fc2_b"], 0.0)
    return h @ tp["reg_w"].T + tp["reg_b"]


def kernel_math_reference(kp, x):
    """Same math / dtypes / op ordering as the Pallas kernel, in plain jnp."""
    B = x.shape[0]
    f32 = jnp.float32
    rows = L_OUT * B
    xcol = _im2col_conv1(x)                                             # (rows, 70) bf16
    acc1 = jnp.dot(xcol, kp["w1"], preferred_element_type=f32)
    h1 = jnp.maximum(acc1 + kp["shift1"], 0.0).astype(jnp.bfloat16)     # (rows, 16)
    zeros = jnp.zeros((B, C1), jnp.bfloat16)
    h1p = jnp.concatenate([zeros, h1, zeros], axis=0)                   # (rows+2B, 16)
    acc2 = jnp.dot(h1p[0:rows], kp["w2"][0], preferred_element_type=f32)
    acc2 += jnp.dot(h1p[B:B + rows], kp["w2"][1], preferred_element_type=f32)
    acc2 += jnp.dot(h1p[2 * B:2 * B + rows], kp["w2"][2], preferred_element_type=f32)
    h2 = jnp.maximum(acc2 + kp["shift2"], 0.0).astype(jnp.bfloat16)     # (rows, 64)
    flat = h2.reshape(L_OUT, B, C2).transpose(1, 0, 2).reshape(B, D_FLAT)
    h = jnp.maximum(jnp.dot(flat, kp["wf1"], preferred_element_type=f32) + kp["bf1"], 0.0)
    h = jnp.maximum(jnp.dot(h.astype(jnp.bfloat16), kp["wf2"],
                            preferred_element_type=f32) + kp["bf2"], 0.0)
    return jnp.dot(h.astype(jnp.bfloat16), kp["wr"], preferred_element_type=f32) + kp["br"]


if __name__ == "__main__":
    key = jax.random.PRNGKey(0)
    kp_key, kx_key = jax.random.split(key)
    torch_params = init_torch_like_params(kp_key)
    kparams = prepare_kernel_params(torch_params)

    # (B, L, C) = (2, 30, 14): L=30 gives 64*15 = 960 features into fc1,
    # matching nn.Linear(960, 256) in the module.
    x = jax.random.normal(kx_key, (2, L_IN, C_IN), jnp.float32)

    out = jax.jit(cnn_a_forward)(kparams, x)
    out = jax.block_until_ready(out)
    assert out.shape == (2, 1), out.shape

    # Tight check: identical math/dtypes as the kernel (validates lowering).
    ref_tight = kernel_math_reference(kparams, x)
    assert jnp.allclose(out, ref_tight, atol=5e-3, rtol=5e-3), (out, ref_tight)

    # End-to-end check against the f32 PyTorch-style reference
    # (loose tolerance: kernel weights/activations are bf16).
    ref_f32 = cnn_a_reference(torch_params, x)
    assert jnp.allclose(out, ref_f32, atol=1e-1, rtol=1e-1), (out, ref_f32)

    print("KERNEL_OK")
</pallas_src>

<mosaic_0001>
module attributes {stable_mosaic.version = 11 : i64} {
  func.func @_fused_cnn_a_kernel(%arg0: i32, %arg1: memref<30x70xbf16, #tpu.memory_space<vmem>>, %arg2: memref<70x16xbf16, #tpu.memory_space<vmem>>, %arg3: memref<1x16xf32, #tpu.memory_space<vmem>>, %arg4: memref<3x16x64xbf16, #tpu.memory_space<vmem>>, %arg5: memref<1x64xf32, #tpu.memory_space<vmem>>, %arg6: memref<960x256xbf16, #tpu.memory_space<any>>, %arg7: memref<1x256xf32, #tpu.memory_space<vmem>>, %arg8: memref<256x256xbf16, #tpu.memory_space<any>>, %arg9: memref<1x256xf32, #tpu.memory_space<vmem>>, %arg10: memref<256x1xbf16, #tpu.memory_space<vmem>>, %arg11: memref<1x1xf32, #tpu.memory_space<vmem>>, %arg12: memref<2x1xf32, #tpu.memory_space<vmem>>, %arg13: memref<960x256xbf16, #tpu.memory_space<vmem>>, %arg14: memref<256x256xbf16, #tpu.memory_space<vmem>>, %arg15: memref<34x16xbf16, #tpu.memory_space<vmem>>, %arg16: memref<2x960xbf16, #tpu.memory_space<vmem>>, %arg17: memref<2x!tpu.dma_semaphore, #tpu.memory_space<semaphore_mem>>) attributes {dimension_semantics = [#tpu.dimension_semantics<arbitrary>], iteration_bounds = array<i64: 1>, scalar_prefetch = 0 : i64, scratch_operands = 5 : i64, tpu.core_type = #tpu.core_type<tc>, window_params = [{pipeline_mode = #tpu.pipeline_mode<synchronous>, transform_indices = @transform_0, window_bounds = array<i64: 30, 70>}, {pipeline_mode = #tpu.pipeline_mode<synchronous>, transform_indices = @transform_1, window_bounds = array<i64: 70, 16>}, {pipeline_mode = #tpu.pipeline_mode<synchronous>, transform_indices = @transform_2, window_bounds = array<i64: 1, 16>}, {pipeline_mode = #tpu.pipeline_mode<synchronous>, transform_indices = @transform_3, window_bounds = array<i64: 3, 16, 64>}, {pipeline_mode = #tpu.pipeline_mode<synchronous>, transform_indices = @transform_4, window_bounds = array<i64: 1, 64>}, {}, {pipeline_mode = #tpu.pipeline_mode<synchronous>, transform_indices = @transform_6, window_bounds = array<i64: 1, 256>}, {}, {pipeline_mode = #tpu.pipeline_mode<synchronous>, transform_indices = @transform_8, window_bounds = array<i64: 1, 256>}, {pipeline_mode = #tpu.pipeline_mode<synchronous>, transform_indices = @transform_9, window_bounds = array<i64: 256, 1>}, {pipeline_mode = #tpu.pipeline_mode<synchronous>, transform_indices = @transform_10, window_bounds = array<i64: 1, 1>}, {pipeline_mode = #tpu.pipeline_mode<synchronous>, transform_indices = @transform_11, window_bounds = array<i64: 2, 1>}]} {
    %c0_i32 = arith.constant 0 : i32
    %0 = tpu.memref_slice %arg17[%c0_i32] : memref<2x!tpu.dma_semaphore, #tpu.memory_space<semaphore_mem>> -> memref<1x!tpu.dma_semaphore, #tpu.memory_space<semaphore_mem>>
    %1 = tpu.memref_squeeze %0 : memref<1x!tpu.dma_semaphore, #tpu.memory_space<semaphore_mem>> -> memref<!tpu.dma_semaphore, #tpu.memory_space<semaphore_mem>>
    tpu.enqueue_dma source(%arg6 : memref<960x256xbf16, #tpu.memory_space<any>>) target(%arg13 : memref<960x256xbf16, #tpu.memory_space<vmem>>) target_semaphore(%1 : memref<!tpu.dma_semaphore, #tpu.memory_space<semaphore_mem>>)
    %c1_i32 = arith.constant 1 : i32
    %2 = tpu.memref_slice %arg17[%c1_i32] : memref<2x!tpu.dma_semaphore, #tpu.memory_space<semaphore_mem>> -> memref<1x!tpu.dma_semaphore, #tpu.memory_space<semaphore_mem>>
    %3 = tpu.memref_squeeze %2 : memref<1x!tpu.dma_semaphore, #tpu.memory_space<semaphore_mem>> -> memref<!tpu.dma_semaphore, #tpu.memory_space<semaphore_mem>>
    tpu.enqueue_dma source(%arg8 : memref<256x256xbf16, #tpu.memory_space<any>>) target(%arg14 : memref<256x256xbf16, #tpu.memory_space<vmem>>) target_semaphore(%3 : memref<!tpu.dma_semaphore, #tpu.memory_space<semaphore_mem>>)
    %cst = arith.constant 0.000000e+00 : bf16
    %4 = vector.broadcast %cst : bf16 to vector<2x16xbf16>
    %c0 = arith.constant 0 : index
    %c0_0 = arith.constant 0 : index
    %5 = vector.load %arg15[%c0, %c0_0] : memref<34x16xbf16, #tpu.memory_space<vmem>>, vector<2x16xbf16>
    tpu.vector_store %arg15[%c0, %c0_0], %4 {strides = array<i32>} : memref<34x16xbf16, #tpu.memory_space<vmem>>, vector<2x16xbf16>,
    %c32 = arith.constant 32 : index
    %c0_1 = arith.constant 0 : index
    %6 = vector.load %arg15[%c32, %c0_1] : memref<34x16xbf16, #tpu.memory_space<vmem>>, vector<2x16xbf16>
    tpu.vector_store %arg15[%c32, %c0_1], %4 {strides = array<i32>} : memref<34x16xbf16, #tpu.memory_space<vmem>>, vector<2x16xbf16>,
    %c0_2 = arith.constant 0 : index
    %c0_3 = arith.constant 0 : index
    %7 = vector.load %arg1[%c0_2, %c0_3] : memref<30x70xbf16, #tpu.memory_space<vmem>>, vector<30x70xbf16>
    %c0_4 = arith.constant 0 : index
    %c0_5 = arith.constant 0 : index
    %8 = vector.load %arg2[%c0_4, %c0_5] : memref<70x16xbf16, #tpu.memory_space<vmem>>, vector<70x16xbf16>
    %cst_6 = arith.constant dense<0.000000e+00> : vector<30x16xf32>
    %9 = tpu.matmul %7, %8, %cst_6 {dimension_numbers = #tpu.dot_dimension_numbers<[1], [0], [0], [1], [0, 0, 1, 1], [], []>} : vector<30x70xbf16>, vector<70x16xbf16>, vector<30x16xf32> -> vector<30x16xf32>
    %c0_7 = arith.constant 0 : index
    %c0_8 = arith.constant 0 : index
    %10 = vector.load %arg3[%c0_7, %c0_8] : memref<1x16xf32, #tpu.memory_space<vmem>>, vector<1x16xf32>
    %11 = vector.broadcast %10 : vector<1x16xf32> to vector<30x16xf32>
    %12 = arith.addf %9, %11 : vector<30x16xf32>
    %cst_9 = arith.constant 0.000000e+00 : f32
    %13 = vector.broadcast %cst_9 : f32 to vector<30x16xf32>
    %14 = arith.maximumf %12, %13 : vector<30x16xf32>
    %15 = arith.truncf %14 : vector<30x16xf32> to vector<30x16xbf16>
    %c2 = arith.constant 2 : index
    %c0_10 = arith.constant 0 : index
    %16 = vector.load %arg15[%c2, %c0_10] : memref<34x16xbf16, #tpu.memory_space<vmem>>, vector<30x16xbf16>
    tpu.vector_store %arg15[%c2, %c0_10], %15 {strides = array<i32>} : memref<34x16xbf16, #tpu.memory_space<vmem>>, vector<30x16xbf16>,
    %c0_11 = arith.constant 0 : index
    %c0_12 = arith.constant 0 : index
    %c0_13 = arith.constant 0 : index
    %17 = vector.load %arg4[%c0_11, %c0_12, %c0_13] : memref<3x16x64xbf16, #tpu.memory_space<vmem>>, vector<3x16x64xbf16>
    %c0_14 = arith.constant 0 : index
    %c0_15 = arith.constant 0 : index
    %18 = vector.load %arg15[%c0_14, %c0_15] : memref<34x16xbf16, #tpu.memory_space<vmem>>, vector<30x16xbf16>
    %19 = vector.extract_strided_slice %17 {offsets = [0, 0, 0], sizes = [1, 16, 64], strides = [1, 1, 1]} : vector<3x16x64xbf16> to vector<1x16x64xbf16>
    %20 = vector.shape_cast %19 : vector<1x16x64xbf16> to vector<16x64xbf16>
    %cst_16 = arith.constant dense<0.000000e+00> : vector<30x64xf32>
    %21 = tpu.matmul %18, %20, %cst_16 {dimension_numbers = #tpu.dot_dimension_numbers<[1], [0], [0], [1], [0, 0, 1, 1], [], []>} : vector<30x16xbf16>, vector<16x64xbf16>, vector<30x64xf32> -> vector<30x64xf32>
    %22 = vector.extract_strided_slice %17 {offsets = [1, 0, 0], sizes = [1, 16, 64], strides = [1, 1, 1]} : vector<3x16x64xbf16> to vector<1x16x64xbf16>
    %23 = vector.shape_cast %22 : vector<1x16x64xbf16> to vector<16x64xbf16>
    %cst_17 = arith.constant dense<0.000000e+00> : vector<30x64xf32>
    %24 = tpu.matmul %15, %23, %cst_17 {dimension_numbers = #tpu.dot_dimension_numbers<[1], [0], [0], [1], [0, 0, 1, 1], [], []>} : vector<30x16xbf16>, vector<16x64xbf16>, vector<30x64xf32> -> vector<30x64xf32>
    %25 = arith.addf %21, %24 : vector<30x64xf32>
    %c4 = arith.constant 4 : index
    %c0_18 = arith.constant 0 : index
    %26 = vector.load %arg15[%c4, %c0_18] : memref<34x16xbf16, #tpu.memory_space<vmem>>, vector<30x16xbf16>
    %27 = vector.extract_strided_slice %17 {offsets = [2, 0, 0], sizes = [1, 16, 64], strides = [1, 1, 1]} : vector<3x16x64xbf16> to vector<1x16x64xbf16>
    %28 = vector.shape_cast %27 : vector<1x16x64xbf16> to vector<16x64xbf16>
    %cst_19 = arith.constant dense<0.000000e+00> : vector<30x64xf32>
    %29 = tpu.matmul %26, %28, %cst_19 {dimension_numbers = #tpu.dot_dimension_numbers<[1], [0], [0], [1], [0, 0, 1, 1], [], []>} : vector<30x16xbf16>, vector<16x64xbf16>, vector<30x64xf32> -> vector<30x64xf32>
    %30 = arith.addf %25, %29 : vector<30x64xf32>
    %c0_20 = arith.constant 0 : index
    %c0_21 = arith.constant 0 : index
    %31 = vector.load %arg5[%c0_20, %c0_21] : memref<1x64xf32, #tpu.memory_space<vmem>>, vector<1x64xf32>
    %32 = vector.broadcast %31 : vector<1x64xf32> to vector<30x64xf32>
    %33 = arith.addf %30, %32 : vector<30x64xf32>
    %cst_22 = arith.constant 0.000000e+00 : f32
    %34 = vector.broadcast %cst_22 : f32 to vector<30x64xf32>
    %35 = arith.maximumf %33, %34 : vector<30x64xf32>
    %36 = arith.truncf %35 : vector<30x64xf32> to vector<30x64xbf16>
    %37 = vector.extract_strided_slice %36 {offsets = [0, 0], sizes = [2, 64], strides = [1, 1]} : vector<30x64xbf16> to vector<2x64xbf16>
    %c0_23 = arith.constant 0 : index
    %c0_24 = arith.constant 0 : index
    %38 = vector.load %arg16[%c0_23, %c0_24] : memref<2x960xbf16, #tpu.memory_space<vmem>>, vector<2x64xbf16>
    tpu.vector_store %arg16[%c0_23, %c0_24], %37 {strides = array<i32>} : memref<2x960xbf16, #tpu.memory_space<vmem>>, vector<2x64xbf16>,
    %39 = vector.extract_strided_slice %36 {offsets = [2, 0], sizes = [2, 64], strides = [1, 1]} : vector<30x64xbf16> to vector<2x64xbf16>
    %c0_25 = arith.constant 0 : index
    %c64 = arith.constant 64 : index
    %40 = vector.load %arg16[%c0_25, %c64] : memref<2x960xbf16, #tpu.memory_space<vmem>>, vector<2x64xbf16>
    tpu.vector_store %arg16[%c0_25, %c64], %39 {strides = array<i32>} : memref<2x960xbf16, #tpu.memory_space<vmem>>, vector<2x64xbf16>,
    %41 = vector.extract_strided_slice %36 {offsets = [4, 0], sizes = [2, 64], strides = [1, 1]} : vector<30x64xbf16> to vector<2x64xbf16>
    %c0_26 = arith.constant 0 : index
    %c128 = arith.constant 128 : index
    %42 = vector.load %arg16[%c0_26, %c128] : memref<2x960xbf16, #tpu.memory_space<vmem>>, vector<2x64xbf16>
    tpu.vector_store %arg16[%c0_26, %c128], %41 {strides = array<i32>} : memref<2x960xbf16, #tpu.memory_space<vmem>>, vector<2x64xbf16>,
    %43 = vector.extract_strided_slice %36 {offsets = [6, 0], sizes = [2, 64], strides = [1, 1]} : vector<30x64xbf16> to vector<2x64xbf16>
    %c0_27 = arith.constant 0 : index
    %c192 = arith.constant 192 : index
    %44 = vector.load %arg16[%c0_27, %c192] : memref<2x960xbf16, #tpu.memory_space<vmem>>, vector<2x64xbf16>
    tpu.vector_store %arg16[%c0_27, %c192], %43 {strides = array<i32>} : memref<2x960xbf16, #tpu.memory_space<vmem>>, vector<2x64xbf16>,
    %45 = vector.extract_strided_slice %36 {offsets = [8, 0], sizes = [2, 64], strides = [1, 1]} : vector<30x64xbf16> to vector<2x64xbf16>
    %c0_28 = arith.constant 0 : index
    %c256 = arith.constant 256 : index
    %46 = vector.load %arg16[%c0_28, %c256] : memref<2x960xbf16, #tpu.memory_space<vmem>>, vector<2x64xbf16>
    tpu.vector_store %arg16[%c0_28, %c256], %45 {strides = array<i32>} : memref<2x960xbf16, #tpu.memory_space<vmem>>, vector<2x64xbf16>,
    %47 = vector.extract_strided_slice %36 {offsets = [10, 0], sizes = [2, 64], strides = [1, 1]} : vector<30x64xbf16> to vector<2x64xbf16>
    %c0_29 = arith.constant 0 : index
    %c320 = arith.constant 320 : index
    %48 = vector.load %arg16[%c0_29, %c320] : memref<2x960xbf16, #tpu.memory_space<vmem>>, vector<2x64xbf16>
    tpu.vector_store %arg16[%c0_29, %c320], %47 {strides = array<i32>} : memref<2x960xbf16, #tpu.memory_space<vmem>>, vector<2x64xbf16>,
    %49 = vector.extract_strided_slice %36 {offsets = [12, 0], sizes = [2, 64], strides = [1, 1]} : vector<30x64xbf16> to vector<2x64xbf16>
    %c0_30 = arith.constant 0 : index
    %c384 = arith.constant 384 : index
    %50 = vector.load %arg16[%c0_30, %c384] : memref<2x960xbf16, #tpu.memory_space<vmem>>, vector<2x64xbf16>
    tpu.vector_store %arg16[%c0_30, %c384], %49 {strides = array<i32>} : memref<2x960xbf16, #tpu.memory_space<vmem>>, vector<2x64xbf16>,
    %51 = vector.extract_strided_slice %36 {offsets = [14, 0], sizes = [2, 64], strides = [1, 1]} : vector<30x64xbf16> to vector<2x64xbf16>
    %c0_31 = arith.constant 0 : index
    %c448 = arith.constant 448 : index
    %52 = vector.load %arg16[%c0_31, %c448] : memref<2x960xbf16, #tpu.memory_space<vmem>>, vector<2x64xbf16>
    tpu.vector_store %arg16[%c0_31, %c448], %51 {strides = array<i32>} : memref<2x960xbf16, #tpu.memory_space<vmem>>, vector<2x64xbf16>,
    %53 = vector.extract_strided_slice %36 {offsets = [16, 0], sizes = [2, 64], strides = [1, 1]} : vector<30x64xbf16> to vector<2x64xbf16>
    %c0_32 = arith.constant 0 : index
    %c512 = arith.constant 512 : index
    %54 = vector.load %arg16[%c0_32, %c512] : memref<2x960xbf16, #tpu.memory_space<vmem>>, vector<2x64xbf16>
    tpu.vector_store %arg16[%c0_32, %c512], %53 {strides = array<i32>} : memref<2x960xbf16, #tpu.memory_space<vmem>>, vector<2x64xbf16>,
    %55 = vector.extract_strided_slice %36 {offsets = [18, 0], sizes = [2, 64], strides = [1, 1]} : vector<30x64xbf16> to vector<2x64xbf16>
    %c0_33 = arith.constant 0 : index
    %c576 = arith.constant 576 : index
    %56 = vector.load %arg16[%c0_33, %c576] : memref<2x960xbf16, #tpu.memory_space<vmem>>, vector<2x64xbf16>
    tpu.vector_store %arg16[%c0_33, %c576], %55 {strides = array<i32>} : memref<2x960xbf16, #tpu.memory_space<vmem>>, vector<2x64xbf16>,
    %57 = vector.extract_strided_slice %36 {offsets = [20, 0], sizes = [2, 64], strides = [1, 1]} : vector<30x64xbf16> to vector<2x64xbf16>
    %c0_34 = arith.constant 0 : index
    %c640 = arith.constant 640 : index
    %58 = vector.load %arg16[%c0_34, %c640] : memref<2x960xbf16, #tpu.memory_space<vmem>>, vector<2x64xbf16>
    tpu.vector_store %arg16[%c0_34, %c640], %57 {strides = array<i32>} : memref<2x960xbf16, #tpu.memory_space<vmem>>, vector<2x64xbf16>,
    %59 = vector.extract_strided_slice %36 {offsets = [22, 0], sizes = [2, 64], strides = [1, 1]} : vector<30x64xbf16> to vector<2x64xbf16>
    %c0_35 = arith.constant 0 : index
    %c704 = arith.constant 704 : index
    %60 = vector.load %arg16[%c0_35, %c704] : memref<2x960xbf16, #tpu.memory_space<vmem>>, vector<2x64xbf16>
    tpu.vector_store %arg16[%c0_35, %c704], %59 {strides = array<i32>} : memref<2x960xbf16, #tpu.memory_space<vmem>>, vector<2x64xbf16>,
    %61 = vector.extract_strided_slice %36 {offsets = [24, 0], sizes = [2, 64], strides = [1, 1]} : vector<30x64xbf16> to vector<2x64xbf16>
    %c0_36 = arith.constant 0 : index
    %c768 = arith.constant 768 : index
    %62 = vector.load %arg16[%c0_36, %c768] : memref<2x960xbf16, #tpu.memory_space<vmem>>, vector<2x64xbf16>
    tpu.vector_store %arg16[%c0_36, %c768], %61 {strides = array<i32>} : memref<2x960xbf16, #tpu.memory_space<vmem>>, vector<2x64xbf16>,
    %63 = vector.extract_strided_slice %36 {offsets = [26, 0], sizes = [2, 64], strides = [1, 1]} : vector<30x64xbf16> to vector<2x64xbf16>
    %c0_37 = arith.constant 0 : index
    %c832 = arith.constant 832 : index
    %64 = vector.load %arg16[%c0_37, %c832] : memref<2x960xbf16, #tpu.memory_space<vmem>>, vector<2x64xbf16>
    tpu.vector_store %arg16[%c0_37, %c832], %63 {strides = array<i32>} : memref<2x960xbf16, #tpu.memory_space<vmem>>, vector<2x64xbf16>,
    %65 = vector.extract_strided_slice %36 {offsets = [28, 0], sizes = [2, 64], strides = [1, 1]} : vector<30x64xbf16> to vector<2x64xbf16>
    %c0_38 = arith.constant 0 : index
    %c896 = arith.constant 896 : index
    %66 = vector.load %arg16[%c0_38, %c896] : memref<2x960xbf16, #tpu.memory_space<vmem>>, vector<2x64xbf16>
    tpu.vector_store %arg16[%c0_38, %c896], %65 {strides = array<i32>} : memref<2x960xbf16, #tpu.memory_space<vmem>>, vector<2x64xbf16>,
    %c0_i32_39 = arith.constant 0 : i32
    %67 = tpu.memref_slice %arg17[%c0_i32_39] : memref<2x!tpu.dma_semaphore, #tpu.memory_space<semaphore_mem>> -> memref<1x!tpu.dma_semaphore, #tpu.memory_space<semaphore_mem>>
    %68 = tpu.memref_squeeze %67 : memref<1x!tpu.dma_semaphore, #tpu.memory_space<semaphore_mem>> -> memref<!tpu.dma_semaphore, #tpu.memory_space<semaphore_mem>>
    tpu.wait_dma2 semaphore(%68 : memref<!tpu.dma_semaphore, #tpu.memory_space<semaphore_mem>>) src(%arg6 : memref<960x256xbf16, #tpu.memory_space<any>>) dst(%arg13 : memref<960x256xbf16, #tpu.memory_space<vmem>>)
    %c0_40 = arith.constant 0 : index
    %c0_41 = arith.constant 0 : index
    %69 = vector.load %arg16[%c0_40, %c0_41] : memref<2x960xbf16, #tpu.memory_space<vmem>>, vector<2x960xbf16>
    %c0_42 = arith.constant 0 : index
    %c0_43 = arith.constant 0 : index
    %70 = vector.load %arg13[%c0_42, %c0_43] : memref<960x256xbf16, #tpu.memory_space<vmem>>, vector<960x256xbf16>
    %cst_44 = arith.constant dense<0.000000e+00> : vector<2x256xf32>
    %71 = tpu.matmul %69, %70, %cst_44 {dimension_numbers = #tpu.dot_dimension_numbers<[1], [0], [0], [1], [0, 0, 1, 1], [], []>} : vector<2x960xbf16>, vector<960x256xbf16>, vector<2x256xf32> -> vector<2x256xf32>
    %c0_45 = arith.constant 0 : index
    %c0_46 = arith.constant 0 : index
    %72 = vector.load %arg7[%c0_45, %c0_46] : memref<1x256xf32, #tpu.memory_space<vmem>>, vector<1x256xf32>
    %73 = vector.broadcast %72 : vector<1x256xf32> to vector<2x256xf32>
    %74 = arith.addf %71, %73 : vector<2x256xf32>
    %cst_47 = arith.constant 0.000000e+00 : f32
    %75 = vector.broadcast %cst_47 : f32 to vector<2x256xf32>
    %76 = arith.maximumf %74, %75 : vector<2x256xf32>
    %77 = arith.truncf %76 : vector<2x256xf32> to vector<2x256xbf16>
    %c1_i32_48 = arith.constant 1 : i32
    %78 = tpu.memref_slice %arg17[%c1_i32_48] : memref<2x!tpu.dma_semaphore, #tpu.memory_space<semaphore_mem>> -> memref<1x!tpu.dma_semaphore, #tpu.memory_space<semaphore_mem>>
    %79 = tpu.memref_squeeze %78 : memref<1x!tpu.dma_semaphore, #tpu.memory_space<semaphore_mem>> -> memref<!tpu.dma_semaphore, #tpu.memory_space<semaphore_mem>>
    tpu.wait_dma2 semaphore(%79 : memref<!tpu.dma_semaphore, #tpu.memory_space<semaphore_mem>>) src(%arg8 : memref<256x256xbf16, #tpu.memory_space<any>>) dst(%arg14 : memref<256x256xbf16, #tpu.memory_space<vmem>>)
    %c0_49 = arith.constant 0 : index
    %c0_50 = arith.constant 0 : index
    %80 = vector.load %arg14[%c0_49, %c0_50] : memref<256x256xbf16, #tpu.memory_space<vmem>>, vector<256x256xbf16>
    %cst_51 = arith.constant dense<0.000000e+00> : vector<2x256xf32>
    %81 = tpu.matmul %77, %80, %cst_51 {dimension_numbers = #tpu.dot_dimension_numbers<[1], [0], [0], [1], [0, 0, 1, 1], [], []>} : vector<2x256xbf16>, vector<256x256xbf16>, vector<2x256xf32> -> vector<2x256xf32>
    %c0_52 = arith.constant 0 : index
    %c0_53 = arith.constant 0 : index
    %82 = vector.load %arg9[%c0_52, %c0_53] : memref<1x256xf32, #tpu.memory_space<vmem>>, vector<1x256xf32>
    %83 = vector.broadcast %82 : vector<1x256xf32> to vector<2x256xf32>
    %84 = arith.addf %81, %83 : vector<2x256xf32>
    %cst_54 = arith.constant 0.000000e+00 : f32
    %85 = vector.broadcast %cst_54 : f32 to vector<2x256xf32>
    %86 = arith.maximumf %84, %85 : vector<2x256xf32>
    %87 = arith.truncf %86 : vector<2x256xf32> to vector<2x256xbf16>
    %c0_55 = arith.constant 0 : index
    %c0_56 = arith.constant 0 : index
    %88 = vector.load %arg10[%c0_55, %c0_56] : memref<256x1xbf16, #tpu.memory_space<vmem>>, vector<256x1xbf16>
    %cst_57 = arith.constant dense<0.000000e+00> : vector<2x1xf32>
    %89 = tpu.matmul %87, %88, %cst_57 {dimension_numbers = #tpu.dot_dimension_numbers<[1], [0], [0], [1], [0, 0, 1, 1], [], []>} : vector<2x256xbf16>, vector<256x1xbf16>, vector<2x1xf32> -> vector<2x1xf32>
    %c0_58 = arith.constant 0 : index
    %c0_59 = arith.constant 0 : index
    %90 = vector.load %arg11[%c0_58, %c0_59] : memref<1x1xf32, #tpu.memory_space<vmem>>, vector<1x1xf32>
    %91 = vector.broadcast %90 : vector<1x1xf32> to vector<2x1xf32>
    %92 = arith.addf %89, %91 : vector<2x1xf32>
    %c0_60 = arith.constant 0 : index
    %c0_61 = arith.constant 0 : index
    %93 = vector.load %arg12[%c0_60, %c0_61] : memref<2x1xf32, #tpu.memory_space<vmem>>, vector<2x1xf32>
    tpu.vector_store %arg12[%c0_60, %c0_61], %92 {strides = array<i32>} : memref<2x1xf32, #tpu.memory_space<vmem>>, vector<2x1xf32>,
    return
  }
  func.func @transform_0(%arg0: i32) -> (i32, i32) {
    %c0_i32 = arith.constant 0 : i32
    %c0_i32_0 = arith.constant 0 : i32
    %c0_i32_1 = arith.constant 0 : i32
    return %c0_i32, %c0_i32_0 : i32, i32
  }
  func.func @transform_1(%arg0: i32) -> (i32, i32) {
    %c0_i32 = arith.constant 0 : i32
    %c0_i32_0 = arith.constant 0 : i32
    %c0_i32_1 = arith.constant 0 : i32
    return %c0_i32, %c0_i32_0 : i32, i32
  }
  func.func @transform_2(%arg0: i32) -> (i32, i32) {
    %c0_i32 = arith.constant 0 : i32
    %c0_i32_0 = arith.constant 0 : i32
    %c0_i32_1 = arith.constant 0 : i32
    return %c0_i32, %c0_i32_0 : i32, i32
  }
  func.func @transform_3(%arg0: i32) -> (i32, i32, i32) {
    %c0_i32 = arith.constant 0 : i32
    %c0_i32_0 = arith.constant 0 : i32
    %c0_i32_1 = arith.constant 0 : i32
    %c0_i32_2 = arith.constant 0 : i32
    return %c0_i32, %c0_i32_0, %c0_i32_1 : i32, i32, i32
  }
  func.func @transform_4(%arg0: i32) -> (i32, i32) {
    %c0_i32 = arith.constant 0 : i32
    %c0_i32_0 = arith.constant 0 : i32
    %c0_i32_1 = arith.constant 0 : i32
    return %c0_i32, %c0_i32_0 : i32, i32
  }
  func.func @transform_6(%arg0: i32) -> (i32, i32) {
    %c0_i32 = arith.constant 0 : i32
    %c0_i32_0 = arith.constant 0 : i32
    %c0_i32_1 = arith.constant 0 : i32
    return %c0_i32, %c0_i32_0 : i32, i32
  }
  func.func @transform_8(%arg0: i32) -> (i32, i32) {
    %c0_i32 = arith.constant 0 : i32
    %c0_i32_0 = arith.constant 0 : i32
    %c0_i32_1 = arith.constant 0 : i32
    return %c0_i32, %c0_i32_0 : i32, i32
  }
  func.func @transform_9(%arg0: i32) -> (i32, i32) {
    %c0_i32 = arith.constant 0 : i32
    %c0_i32_0 = arith.constant 0 : i32
    %c0_i32_1 = arith.constant 0 : i32
    return %c0_i32, %c0_i32_0 : i32, i32
  }
  func.func @transform_10(%arg0: i32) -> (i32, i32) {
    %c0_i32 = arith.constant 0 : i32
    %c0_i32_0 = arith.constant 0 : i32
    %c0_i32_1 = arith.constant 0 : i32
    return %c0_i32, %c0_i32_0 : i32, i32
  }
  func.func @transform_11(%arg0: i32) -> (i32, i32) {
    %c0_i32 = arith.constant 0 : i32
    %c0_i32_0 = arith.constant 0 : i32
    %c0_i32_1 = arith.constant 0 : i32
    return %c0_i32, %c0_i32_0 : i32, i32
  }
}

</mosaic_0001>

<bundles_post_ra>
// kernel: cnn_a_forward.1
= control target key start
LH: loop header
LB: loop body
LE: loop exit
PB: predicated region body
PF: predicated region fallthrough
CT: control target
= control target key end

     0   :  { %s3847_s0 = inlined_call_operand.vmem [shape: bf16[30,70], index: 0, kind: input, shape index: {}]   ;;  %s3848_s1 = inlined_call_operand.vmem [shape: bf16[70,16], index: 1, kind: input, shape index: {}]   ;;  %s3849_s2 = inlined_call_operand.vmem [shape: f32[1,16], index: 2, kind: input, shape index: {}]   ;;  %s3850_s3 = inlined_call_operand.hbm [shape: bf16[3,16,64], index: 3, kind: input, shape index: {}]   ;;  %s3851_s4 = inlined_call_operand.hbm [shape: f32[1,64], index: 4, kind: input, shape index: {}]   ;;  %s3852_s5 = inlined_call_operand.vmem [shape: bf16[960,256], index: 5, kind: input, shape index: {}]   ;;  %s3853_s6 = inlined_call_operand.vmem [shape: f32[1,256], index: 6, kind: input, shape index: {}]   ;;  %s3854_s7 = inlined_call_operand.hbm [shape: bf16[256,256], index: 7, kind: input, shape index: {}]   ;;  %s3855_s8 = inlined_call_operand.vmem [shape: f32[1,256], index: 8, kind: input, shape index: {}]   ;;  %s3856_s9 = inlined_call_operand.vmem [shape: bf16[256,1], index: 9, kind: input, shape index: {}]   ;;  %s3857_s10 = inlined_call_operand.<no memory space> [shape: f32[1,1], index: 10, kind: input, shape index: {}]   ;;  %s3858_s11 = inlined_call_operand.vmem [shape: f32[2,1], index: 11, kind: output, shape index: {}]  }
   0x1   :  { %v16_v0 = vstv %s3857_s10 }
   0x2   :  { %17 = vst [vmem:[#allocation7] sm:$0x1] %v16_v0 }
   0x3   :  { %18 = vsyncpa [#allocation9], 0 }
   0x4   :  { %19 = vsyncpa [#allocation11], 0  ;;  %s2763_s19 = smov [#allocation8]  }
   0x5   :  { %s31_s20 = sshll.u32 %s2763_s19, 4  ;;  %s32_s20 = int_to_ptr.vmem [resolvable:$true] %s31_s20 }
   0x6   :  { %s2703_s21 = scalar_lea.vmem %s32_s20, 384  ;;  %p2708_p1 = scmp.lt.s32.totalorder %s32_s20, %s32_s20 }
   0x7   :  { %p2704_p0 = scmp.ne.s32.totalorder %s32_s20, %s2703_s21  ;;  %p2709_p2 = scmp.lt.s32.totalorder %s2703_s21, %s2703_s21 }
   0x9   :  { %p2710_p3 = por %p2709_p2, %p2708_p1 }
   0xb   :  { %p2711_p4 = pnand %p2710_p3, %p2704_p0 }
   0xd   :  { %2714 = shalt.err (!%p2711_p4)
}
   0xe   :  { %s2764_s22 = smov 64   ;;  %s2765_s23 = smov 4  }
   0xf   :  { %37 = dma.hbm_to_vmem [thread:$0]  %s3850_s3, 384, %s32_s20, [#allocation9], %s2764_s22, %s2764_s22, %s2765_s23  }
  0x10   :  { %s2766_s10 = smov [#allocation10]  }
  0x11   :  { %s44_s26 = sshll.u32 %s2766_s10, 4  ;;  %s45_s26 = int_to_ptr.vmem [resolvable:$true] %s44_s26 }
  0x12   :  { %s2723_s27 = scalar_lea.vmem %s45_s26, 16  ;;  %s2727_s28 = scalar_lea.vmem %s45_s26, 32 }
  0x13   :  { %p2724_p5 = scmp.ne.s32.totalorder %s45_s26, %s2723_s27  ;;  %p2728_p6 = scmp.lt.s32.totalorder %s45_s26, %s45_s26 }
  0x14   :  { %p2729_p7 = scmp.lt.s32.totalorder %s2727_s28, %s2723_s27 }
  0x16   :  { %p2730_p8 = por %p2729_p7, %p2728_p6 }
  0x18   :  { %p2731_p9 = pnand %p2730_p8, %p2724_p5 }
  0x1a   :  { %2734 = shalt.err (!%p2731_p9)
}
  0x1b   :  { %47 = dma.hbm_to_vmem [thread:$0]  %s3851_s4, 16, %s45_s26, [#allocation11]  }
  0x1c   :  { %2755 = dma.done.wait [#allocation9], 384  }
  0x1d   :  { %2756 = vsyncadd [#allocation9], 4294966912 }
  0x1e   :  { %2757 = dma.done.wait [#allocation11], 16  }
  0x1f   :  { %2758 = vsyncadd [#allocation11], 4294967280  ;;  %v2844_v1 = vld [vmem:[%s3852_s5] sm:$0xff]  ;;  %v2849_v2 = vld [vmem:[%s3852_s5 + $0x8] sm:$0xff]  ;;  %vm423_vm0 = vcmask 1042432   ;;  %vm416_vm1 = vcmask 572416  }
  0x20   :  { %v2854_v3 = vld [vmem:[%s3852_s5 + $0x10] sm:$0xff]  ;;  %v2859_v4 = vld [vmem:[%s3852_s5 + $0x18] sm:$0xff]  ;;  %v2864_v5 = vld [vmem:[%s3852_s5 + $0x20] sm:$0xff] }
  0x21   :  { %v2869_v6 = vld [vmem:[%s3852_s5 + $0x28] sm:$0xff]  ;;  %v2874_v7 = vld [vmem:[%s3852_s5 + $0x30] sm:$0xff]  ;;  %v2879_v8 = vld [vmem:[%s3852_s5 + $0x38] sm:$0xff] }
  0x22   :  { %v2884_v9 = vld [vmem:[%s3852_s5 + $0x40] sm:$0xff]  ;;  %v2889_v10 = vld [vmem:[%s3852_s5 + $0x48] sm:$0xff]  ;;  %v2894_v11 = vld [vmem:[%s3852_s5 + $0x50] sm:$0xff] }
  0x23   :  { %v2899_v12 = vld [vmem:[%s3852_s5 + $0x58] sm:$0xff]  ;;  %v2904_v13 = vld [vmem:[%s3852_s5 + $0x60] sm:$0xff]  ;;  %v2909_v14 = vld [vmem:[%s3852_s5 + $0x68] sm:$0xff] }
  0x24   :  { %v2914_v15 = vld [vmem:[%s3852_s5 + $0x70] sm:$0xff]  ;;  %v2919_v16 = vld [vmem:[%s3852_s5 + $0x78] sm:$0xff]  ;;  %v2924_v17 = vld [vmem:[%s3852_s5 + $0x80] sm:$0xff] }
  0x25   :  { %3942 = vst [vmem:[#allocation21_spill] sm:$0xff] %v2924_v17  ;;  %v2929_v18 = vld [vmem:[%s3852_s5 + $0x88] sm:$0xff]  ;;  %v2934_v19 = vld [vmem:[%s3852_s5 + $0x90] sm:$0xff]  ;;  %v2939_v20 = vld [vmem:[%s3852_s5 + $0x98] sm:$0xff] }
  0x26   :  { %3943 = vst [vmem:[#allocation22_spill] sm:$0xff] %v2929_v18  ;;  %3944 = vst [vmem:[#allocation23_spill] sm:$0xff] %v2934_v19  ;;  %v2944_v21 = vld [vmem:[%s3852_s5 + $0xa0] sm:$0xff]  ;;  %v2949_v22 = vld [vmem:[%s3852_s5 + $0xa8] sm:$0xff] }
  0x27   :  { %3945 = vst [vmem:[#allocation24_spill] sm:$0xff] %v2939_v20  ;;  %3946 = vst [vmem:[#allocation25_spill] sm:$0xff] %v2944_v21  ;;  %v2954_v23 = vld [vmem:[%s3852_s5 + $0xb0] sm:$0xff]  ;;  %v2959_v24 = vld [vmem:[%s3852_s5 + $0xb8] sm:$0xff] }
  0x28   :  { %3947 = vst [vmem:[#allocation26_spill] sm:$0xff] %v2949_v22  ;;  %3948 = vst [vmem:[#allocation27_spill] sm:$0xff] %v2954_v23  ;;  %v2964_v25 = vld [vmem:[%s3852_s5 + $0xc0] sm:$0xff]  ;;  %v2969_v26 = vld [vmem:[%s3852_s5 + $0xc8] sm:$0xff] }
  0x29   :  { %3949 = vst [vmem:[#allocation28_spill] sm:$0xff] %v2959_v24  ;;  %3950 = vst [vmem:[#allocation29_spill] sm:$0xff] %v2964_v25  ;;  %v2974_v27 = vld [vmem:[%s3852_s5 + $0xd0] sm:$0xff]  ;;  %v2979_v28 = vld [vmem:[%s3852_s5 + $0xd8] sm:$0xff] }
  0x2a   :  { %3951 = vst [vmem:[#allocation30_spill] sm:$0xff] %v2969_v26  ;;  %3952 = vst [vmem:[#allocation31_spill] sm:$0xff] %v2974_v27  ;;  %v2984_v29 = vld [vmem:[%s3852_s5 + $0xe0] sm:$0xff]  ;;  %v2989_v30 = vld [vmem:[%s3852_s5 + $0xe8] sm:$0xff] }
  0x2b   :  { %3953 = vst [vmem:[#allocation32_spill] sm:$0xff] %v2979_v28  ;;  %3954 = vst [vmem:[#allocation33_spill] sm:$0xff] %v2984_v29  ;;  %v2994_v31 = vld [vmem:[%s3852_s5 + $0xf0] sm:$0xff]  ;;  %v2999_v32 = vld [vmem:[%s3852_s5 + $0xf8] sm:$0xff] }
  0x2c   :  { %v3004_v33 = vld [vmem:[%s3852_s5 + $0x100] sm:$0xff]  ;;  %v3009_v34 = vld [vmem:[%s3852_s5 + $0x108] sm:$0xff]  ;;  %v3014_v35 = vld [vmem:[%s3852_s5 + $0x110] sm:$0xff] }
  0x2d   :  { %v3019_v36 = vld [vmem:[%s3852_s5 + $0x118] sm:$0xff]  ;;  %v3024_v37 = vld [vmem:[%s3852_s5 + $0x120] sm:$0xff]  ;;  %v3029_v38 = vld [vmem:[%s3852_s5 + $0x128] sm:$0xff] }
  0x2e   :  { %v3034_v39 = vld [vmem:[%s3852_s5 + $0x130] sm:$0xff]  ;;  %v3039_v40 = vld [vmem:[%s3852_s5 + $0x138] sm:$0xff]  ;;  %v3044_v41 = vld [vmem:[%s3852_s5 + $0x140] sm:$0xff] }
  0x2f   :  { %v3049_v42 = vld [vmem:[%s3852_s5 + $0x148] sm:$0xff]  ;;  %v3054_v43 = vld [vmem:[%s3852_s5 + $0x150] sm:$0xff]  ;;  %v3059_v44 = vld [vmem:[%s3852_s5 + $0x158] sm:$0xff] }
  0x30   :  { %v3064_v45 = vld [vmem:[%s3852_s5 + $0x160] sm:$0xff]  ;;  %v3069_v46 = vld [vmem:[%s3852_s5 + $0x168] sm:$0xff]  ;;  %v3074_v47 = vld [vmem:[%s3852_s5 + $0x170] sm:$0xff] }
  0x31   :  { %v3079_v48 = vld [vmem:[%s3852_s5 + $0x178] sm:$0xff]  ;;  %v3084_v49 = vld [vmem:[%s3852_s5 + $0x180] sm:$0xff]  ;;  %v3089_v50 = vld [vmem:[%s3852_s5 + $0x188] sm:$0xff] }
  0x32   :  { %3955 = vst [vmem:[#allocation34_spill] sm:$0xff] %v3084_v49  ;;  %3956 = vst [vmem:[#allocation35_spill] sm:$0xff] %v3089_v50  ;;  %v3094_v51 = vld [vmem:[%s3852_s5 + $0x190] sm:$0xff]  ;;  %v3099_v52 = vld [vmem:[%s3852_s5 + $0x198] sm:$0xff] }
  0x33   :  { %3957 = vst [vmem:[#allocation36_spill] sm:$0xff] %v3094_v51  ;;  %3958 = vst [vmem:[#allocation37_spill] sm:$0xff] %v3099_v52  ;;  %v3104_v53 = vld [vmem:[%s3852_s5 + $0x1a0] sm:$0xff]  ;;  %v3109_v54 = vld [vmem:[%s3852_s5 + $0x1a8] sm:$0xff] }
  0x34   :  { %3959 = vst [vmem:[#allocation38_spill] sm:$0xff] %v3104_v53  ;;  %3960 = vst [vmem:[#allocation39_spill] sm:$0xff] %v3109_v54  ;;  %v3114_v55 = vld [vmem:[%s3852_s5 + $0x1b0] sm:$0xff]  ;;  %v3119_v56 = vld [vmem:[%s3852_s5 + $0x1b8] sm:$0xff] }
  0x35   :  { %3961 = vst [vmem:[#allocation40_spill] sm:$0xff] %v3114_v55  ;;  %3962 = vst [vmem:[#allocation41_spill] sm:$0xff] %v3119_v56  ;;  %v3124_v57 = vld [vmem:[%s3852_s5 + $0x1c0] sm:$0xff]  ;;  %v3129_v58 = vld [vmem:[%s3852_s5 + $0x1c8] sm:$0xff] }
  0x36   :  { %3963 = vst [vmem:[#allocation42_spill] sm:$0xff] %v3124_v57  ;;  %3964 = vst [vmem:[#allocation43_spill] sm:$0xff] %v3129_v58  ;;  %v3134_v59 = vld [vmem:[%s3852_s5 + $0x1d0] sm:$0xff]  ;;  %v3139_v60 = vld [vmem:[%s3852_s5 + $0x1d8] sm:$0xff] }
  0x37   :  { %3965 = vst [vmem:[#allocation44_spill] sm:$0xff] %v3134_v59  ;;  %3966 = vst [vmem:[#allocation45_spill] sm:$0xff] %v3139_v60  ;;  %v3144_v61 = vld [vmem:[%s3852_s5 + $0x1e0] sm:$0xff]  ;;  %v3149_v62 = vld [vmem:[%s3852_s5 + $0x1e8] sm:$0xff] }
  0x38   :  { %3967 = vst [vmem:[#allocation46_spill] sm:$0xff] %v3144_v61  ;;  %3968 = vst [vmem:[#allocation47_spill] sm:$0xff] %v3149_v62  ;;  %v3154_v63 = vld [vmem:[%s3852_s5 + $0x1f0] sm:$0xff]  ;;  %v3159_v0 = vld [vmem:[%s3852_s5 + $0x1f8] sm:$0xff] }
  0x39   :  { %v3164_v49 = vld [vmem:[%s3852_s5 + $0x200] sm:$0xff]  ;;  %v3169_v50 = vld [vmem:[%s3852_s5 + $0x208] sm:$0xff]  ;;  %v3174_v17 = vld [vmem:[%s3852_s5 + $0x210] sm:$0xff] }
  0x3a   :  { %3969 = vst [vmem:[#allocation48_spill] sm:$0xff] %v3164_v49  ;;  %3970 = vst [vmem:[#allocation49_spill] sm:$0xff] %v3169_v50  ;;  %v3179_v18 = vld [vmem:[%s3852_s5 + $0x218] sm:$0xff]  ;;  %v3184_v51 = vld [vmem:[%s3852_s5 + $0x220] sm:$0xff] }
  0x3b   :  { %3971 = vst [vmem:[#allocation50_spill] sm:$0xff] %v3174_v17  ;;  %3972 = vst [vmem:[#allocation51_spill] sm:$0xff] %v3179_v18  ;;  %v3189_v49 = vld [vmem:[%s3852_s5 + $0x228] sm:$0xff]  ;;  %v3194_v50 = vld [vmem:[%s3852_s5 + $0x230] sm:$0xff] }
  0x3c   :  { %3973 = vst [vmem:[#allocation52_spill] sm:$0xff] %v3184_v51  ;;  %3974 = vst [vmem:[#allocation53_spill] sm:$0xff] %v3189_v49  ;;  %v3199_v17 = vld [vmem:[%s3852_s5 + $0x238] sm:$0xff]  ;;  %v3204_v18 = vld [vmem:[%s3852_s5 + $0x240] sm:$0xff] }
  0x3d   :  { %3975 = vst [vmem:[#allocation54_spill] sm:$0xff] %v3194_v50  ;;  %3976 = vst [vmem:[#allocation55_spill] sm:$0xff] %v3199_v17  ;;  %v3209_v51 = vld [vmem:[%s3852_s5 + $0x248] sm:$0xff]  ;;  %v3214_v49 = vld [vmem:[%s3852_s5 + $0x250] sm:$0xff] }
  0x3e   :  { %3977 = vst [vmem:[#allocation56_spill] sm:$0xff] %v3204_v18  ;;  %3978 = vst [vmem:[#allocation57_spill] sm:$0xff] %v3209_v51  ;;  %v3219_v50 = vld [vmem:[%s3852_s5 + $0x258] sm:$0xff]  ;;  %v3224_v17 = vld [vmem:[%s3852_s5 + $0x260] sm:$0xff] }
  0x3f   :  { %3979 = vst [vmem:[#allocation58_spill] sm:$0xff] %v3214_v49  ;;  %3980 = vst [vmem:[#allocation59_spill] sm:$0xff] %v3219_v50  ;;  %v3229_v18 = vld [vmem:[%s3852_s5 + $0x268] sm:$0xff]  ;;  %v3234_v51 = vld [vmem:[%s3852_s5 + $0x270] sm:$0xff] }
  0x40   :  { %3981 = vst [vmem:[#allocation60_spill] sm:$0xff] %v3224_v17  ;;  %3982 = vst [vmem:[#allocation61_spill] sm:$0xff] %v3229_v18  ;;  %v3239_v49 = vld [vmem:[%s3852_s5 + $0x278] sm:$0xff]  ;;  %v3244_v50 = vld [vmem:[%s3852_s5 + $0x280] sm:$0xff] }
  0x41   :  { %3983 = vst [vmem:[#allocation62_spill] sm:$0xff] %v3234_v51  ;;  %3984 = vst [vmem:[#allocation63_spill] sm:$0xff] %v3239_v49  ;;  %v3249_v17 = vld [vmem:[%s3852_s5 + $0x288] sm:$0xff]  ;;  %v3254_v18 = vld [vmem:[%s3852_s5 + $0x290] sm:$0xff] }
  0x42   :  { %3985 = vst [vmem:[#allocation64_spill] sm:$0xff] %v3244_v50  ;;  %3986 = vst [vmem:[#allocation65_spill] sm:$0xff] %v3249_v17  ;;  %v3259_v51 = vld [vmem:[%s3852_s5 + $0x298] sm:$0xff]  ;;  %v3264_v49 = vld [vmem:[%s3852_s5 + $0x2a0] sm:$0xff] }
  0x43   :  { %3987 = vst [vmem:[#allocation66_spill] sm:$0xff] %v3254_v18  ;;  %3988 = vst [vmem:[#allocation67_spill] sm:$0xff] %v3259_v51  ;;  %v3269_v50 = vld [vmem:[%s3852_s5 + $0x2a8] sm:$0xff]  ;;  %v3274_v17 = vld [vmem:[%s3852_s5 + $0x2b0] sm:$0xff] }
  0x44   :  { %3989 = vst [vmem:[#allocation68_spill] sm:$0xff] %v3264_v49  ;;  %3990 = vst [vmem:[#allocation69_spill] sm:$0xff] %v3269_v50  ;;  %v3279_v18 = vld [vmem:[%s3852_s5 + $0x2b8] sm:$0xff]  ;;  %v3284_v51 = vld [vmem:[%s3852_s5 + $0x2c0] sm:$0xff] }
  0x45   :  { %3991 = vst [vmem:[#allocation70_spill] sm:$0xff] %v3274_v17  ;;  %3992 = vst [vmem:[#allocation71_spill] sm:$0xff] %v3279_v18  ;;  %v3289_v49 = vld [vmem:[%s3852_s5 + $0x2c8] sm:$0xff]  ;;  %v3294_v50 = vld [vmem:[%s3852_s5 + $0x2d0] sm:$0xff] }
  0x46   :  { %3993 = vst [vmem:[#allocation72_spill] sm:$0xff] %v3284_v51  ;;  %3994 = vst [vmem:[#allocation73_spill] sm:$0xff] %v3289_v49  ;;  %v3299_v17 = vld [vmem:[%s3852_s5 + $0x2d8] sm:$0xff]  ;;  %v3304_v18 = vld [vmem:[%s3852_s5 + $0x2e0] sm:$0xff] }
  0x47   :  { %3995 = vst [vmem:[#allocation74_spill] sm:$0xff] %v3294_v50  ;;  %3996 = vst [vmem:[#allocation75_spill] sm:$0xff] %v3299_v17  ;;  %v3309_v51 = vld [vmem:[%s3852_s5 + $0x2e8] sm:$0xff]  ;;  %v3314_v49 = vld [vmem:[%s3852_s5 + $0x2f0] sm:$0xff] }
  0x48   :  { %3997 = vst [vmem:[#allocation76_spill] sm:$0xff] %v3304_v18  ;;  %3998 = vst [vmem:[#allocation77_spill] sm:$0xff] %v3309_v51  ;;  %v3319_v50 = vld [vmem:[%s3852_s5 + $0x2f8] sm:$0xff]  ;;  %v3324_v17 = vld [vmem:[%s3852_s5 + $0x300] sm:$0xff] }
  0x49   :  { %3999 = vst [vmem:[#allocation78_spill] sm:$0xff] %v3314_v49  ;;  %4000 = vst [vmem:[#allocation79_spill] sm:$0xff] %v3319_v50  ;;  %v3329_v18 = vld [vmem:[%s3852_s5 + $0x308] sm:$0xff]  ;;  %v3334_v51 = vld [vmem:[%s3852_s5 + $0x310] sm:$0xff] }
  0x4a   :  { %4001 = vst [vmem:[#allocation80_spill] sm:$0xff] %v3324_v17  ;;  %4002 = vst [vmem:[#allocation81_spill] sm:$0xff] %v3329_v18  ;;  %v3339_v49 = vld [vmem:[%s3852_s5 + $0x318] sm:$0xff]  ;;  %v3344_v50 = vld [vmem:[%s3852_s5 + $0x320] sm:$0xff] }
  0x4b   :  { %4003 = vst [vmem:[#allocation82_spill] sm:$0xff] %v3334_v51  ;;  %4004 = vst [vmem:[#allocation83_spill] sm:$0xff] %v3339_v49  ;;  %v3349_v17 = vld [vmem:[%s3852_s5 + $0x328] sm:$0xff]  ;;  %v3354_v18 = vld [vmem:[%s3852_s5 + $0x330] sm:$0xff] }
  0x4c   :  { %4005 = vst [vmem:[#allocation84_spill] sm:$0xff] %v3344_v50  ;;  %4006 = vst [vmem:[#allocation85_spill] sm:$0xff] %v3349_v17  ;;  %v3359_v51 = vld [vmem:[%s3852_s5 + $0x338] sm:$0xff]  ;;  %v3364_v49 = vld [vmem:[%s3852_s5 + $0x340] sm:$0xff] }
  0x4d   :  { %4007 = vst [vmem:[#allocation86_spill] sm:$0xff] %v3354_v18  ;;  %4008 = vst [vmem:[#allocation87_spill] sm:$0xff] %v3359_v51  ;;  %v3369_v50 = vld [vmem:[%s3852_s5 + $0x348] sm:$0xff]  ;;  %v3374_v17 = vld [vmem:[%s3852_s5 + $0x350] sm:$0xff] }
  0x4e   :  { %4009 = vst [vmem:[#allocation88_spill] sm:$0xff] %v3364_v49  ;;  %4010 = vst [vmem:[#allocation89_spill] sm:$0xff] %v3369_v50  ;;  %v3379_v18 = vld [vmem:[%s3852_s5 + $0x358] sm:$0xff]  ;;  %v3384_v51 = vld [vmem:[%s3852_s5 + $0x360] sm:$0xff] }
  0x4f   :  { %4011 = vst [vmem:[#allocation90_spill] sm:$0xff] %v3374_v17  ;;  %4012 = vst [vmem:[#allocation91_spill] sm:$0xff] %v3379_v18  ;;  %v3389_v49 = vld [vmem:[%s3852_s5 + $0x368] sm:$0xff]  ;;  %v3394_v50 = vld [vmem:[%s3852_s5 + $0x370] sm:$0xff] }
  0x50   :  { %4013 = vst [vmem:[#allocation92_spill] sm:$0xff] %v3384_v51  ;;  %4014 = vst [vmem:[#allocation93_spill] sm:$0xff] %v3389_v49  ;;  %v3399_v17 = vld [vmem:[%s3852_s5 + $0x378] sm:$0xff]  ;;  %v3404_v18 = vld [vmem:[%s3852_s5 + $0x380] sm:$0xff] }
  0x51   :  { %4015 = vst [vmem:[#allocation94_spill] sm:$0xff] %v3394_v50  ;;  %4016 = vst [vmem:[#allocation95_spill] sm:$0xff] %v3399_v17  ;;  %v3409_v51 = vld [vmem:[%s3852_s5 + $0x388] sm:$0xff]  ;;  %v3414_v49 = vld [vmem:[%s3852_s5 + $0x390] sm:$0xff] }
  0x52   :  { %4017 = vst [vmem:[#allocation96_spill] sm:$0xff] %v3404_v18  ;;  %4018 = vst [vmem:[#allocation97_spill] sm:$0xff] %v3409_v51  ;;  %v3419_v50 = vld [vmem:[%s3852_s5 + $0x398] sm:$0xff]  ;;  %v3424_v17 = vld [vmem:[%s3852_s5 + $0x3a0] sm:$0xff] }
  0x53   :  { %4019 = vst [vmem:[#allocation98_spill] sm:$0xff] %v3414_v49  ;;  %4020 = vst [vmem:[#allocation99_spill] sm:$0xff] %v3419_v50  ;;  %v3429_v18 = vld [vmem:[%s3852_s5 + $0x3a8] sm:$0xff]  ;;  %v3434_v51 = vld [vmem:[%s3852_s5 + $0x3b0] sm:$0xff] }
  0x54   :  { %4021 = vst [vmem:[#allocation100_spill] sm:$0xff] %v3424_v17  ;;  %4022 = vst [vmem:[#allocation101_spill] sm:$0xff] %v3429_v18  ;;  %v3439_v49 = vld [vmem:[%s3852_s5 + $0x3b8] sm:$0xff]  ;;  %v2615_v50 = vld [vmem:[%s3848_s1 + $0x20] ss:$0 sps:$4 sm:$0x77]  }
  0x55   :  { %4023 = vst [vmem:[#allocation102_spill] sm:$0xff] %v3434_v51  ;;  %4024 = vst [vmem:[#allocation103_spill] sm:$0xff] %v3439_v49  ;;  %v2616_v17 = vld [vmem:[%s3848_s1 + $0x18] sm:$0xff]   ;;  %2607 = vmatprep.subr.msk.bf16.mxu0 %vm423_vm0, %v2615_v50  ;;  %v425_v18 = vsel %vm423_vm0, %v2615_v50, 0  ;;  %v2617_v51 = vld [vmem:[%s3848_s1 + $0x10] sm:$0xff]  }
  0x56   :  { %2576 = vmatpush3.bf16.msra.mxu0 %v425_v18  ;;  %v2620_v49 = vld [vmem:[%s3847_s0] sm:$0xff]   ;;  %v2618_v52 = vld [vmem:[%s3848_s1 + $0x8] sm:$0xff]  }
  0x57   :  { %2577 = vmatprep.subr.bf16.mxu0 %v2616_v17  ;;  %2585 = vmatprep.mubr.msk.bf16.mxu0 %vm416_vm1, %v2620_v49 }
  0x5a   :  { %2578 = vmatpush3.bf16.msra.mxu0 %v2616_v17 }
  0x5b   :  { %2579 = vmatprep.subr.bf16.mxu0 %v2617_v51 }
  0x5c   :  { %343 = vsyncadd [#allocation6], 15360  ;;  %v2619_v18 = vld [vmem:[%s3848_s1] sm:$0xff]   ;;  %v2621_v50 = vld [vmem:[%s3847_s0 + $0x8] sm:$0x7f]   ;;  %vm356_vm2 = vcmask 122880  }
  0x5d   :  { %v2622_v19 = vld [vmem:[#allocation8 + $0x8] sm:$0xff]   ;;  %v2767_v17 = vmov 0   ;;  %v2623_v49 = vld [vmem:[#allocation8] sm:$0xff]   ;;  %vm492_vm3 = vcmask 1040384   ;;  %vm493_vm4 = vcmask 1044484   ;;  %vm509_vm5 = vcmask 125953  }
  0x5e   :  { %2580 = vmatpush3.bf16.msra.mxu0 %v2617_v51  ;;  %357 = vst.msk [vmem:[#allocation4] sm:$0x1] %vm356_vm2, %v2767_v17  ;;  %358 = vst.msk [vmem:[#allocation4 + $0x10] sm:$0x1] %vm356_vm2, %v2767_v17  ;;  %2595 = vmatprep.subr.bf16.mxu1 %v2623_v49  ;;  %v2625_v51 = vld [vmem:[#allocation8 + $0x10] sm:$0xff]   ;;  %vm511_vm7 = vcmask 125952  }
  0x5f   :  { %2581 = vmatprep.subr.bf16.mxu0 %v2618_v52  ;;  %2596 = vmatpush3.bf16.msra.mxu1 %v2623_v49  ;;  %vm3465_vm6 = vmor %vm492_vm3, %vm493_vm4  ;;  %vm531_vm8 = vcmask 130048   ;;  %vm676_vm9 = vcmask 1045504   ;;  %vm764_vm10 = vcmask 516096   ;;  %s2769_s0 = smov [#allocation3]  }
  0x60   :  { %2601 = vmatprep.subr.bf16.mxu1 %v2625_v51 }
  0x62   :  { %2582 = vmatpush3.bf16.msra.mxu0 %v2618_v52  ;;  %v2330_v52 = vld [vmem:[%s3849_s2] ss:$0 sm:$0xff]  ;;  %s352_s2 = sshll.u32 %s2769_s0, 4  ;;  %s353_s2 = int_to_ptr.vmem [resolvable:$true] %s352_s2 }
  0x63   :  { %2583 = vmatprep.subr.bf16.mxu0 %v2619_v18  ;;  %s2743_s13 = scalar_lea.vmem %s353_s2, 4096  ;;  %p2748_p11 = scmp.lt.s32.totalorder %s353_s2, %s353_s2 }
  0x64   :  { %p2744_p10 = scmp.ne.s32.totalorder %s353_s2, %s2743_s13  ;;  %p2749_p12 = scmp.lt.s32.totalorder %s2743_s13, %s2743_s13 }
  0x66   :  { %2584 = vmatpush3.bf16.msra.mxu0 %v2619_v18  ;;  %p2750_p13 = por %p2749_p12, %p2748_p11 }
  0x67   :  { %2589 = vmatprep.subr.bf16.mxu0 %v2622_v19 }
  0x68   :  { %p2751_p0 = pnand %p2750_p13, %p2744_p10 }
  0x69   :  { %2586 = vmatmul.mubr.msk.bf16.vlgmr.msra.gmra.mxu0 %vm416_vm1, %v2621_v50 }
  0x6a   :  { %2590 = vmatpush3.bf16.msra.mxu0 %v2622_v19 }
 0x129   :  { %v2587_v20 = vpop.f32.mrf.mxu0 }
 0x12a   :  { %v470_v53 = vadd.f32 %v2587_v20, %v2330_v52 }
 0x12b   :  { %v461_v18 = vpop.f32.mrf.mxu0 }
 0x12c   :  { %v478_v50 = vmax.f32 %v470_v53, 0.0  ;;  %v462_v54 = vadd.f32 %v2330_v52, %v461_v18 }
 0x12d   :  { %v2588_v21 = vpop.f32.mrf.mxu0 }
 0x12e   :  { %v2535_v22 = vpack.c.bf16 %v478_v50, %v478_v50  ;;  %v476_v19 = vmax.f32 %v462_v54, 0.0  ;;  %v473_v55 = vadd.f32 %v2588_v21, %v2330_v52 }
 0x12f   :  { %v464_v17 = vpop.f32.mrf.mxu0 }
 0x130   :  { %v500_v56 = vrot.slane %v2535_v22, 7  ;;  %v2533_v49 = vpack.c.bf16 %v476_v19, %v476_v19  ;;  %v479_v23 = vmax.f32 %v473_v55, 0.0  ;;  %v465_v24 = vadd.f32 %v2330_v52, %v464_v17 }
 0x132   :  { %v495_v57 = vrot.slane %v2533_v49, 7  ;;  %v2536_v58 = vpack.c.bf16 %v479_v23, %v479_v23  ;;  %v477_v20 = vmax.f32 %v465_v24, 0.0  ;;  %v502_v53 = vrot.slane %v500_v56, 4  ;;  %v2629_v49 = vld [vmem:[#allocation4 + $0x10] ss:$0 sps:$4 sm:$0x11]  }
 0x133   :  { %v481_v26 = vpack.c.bf16 %v479_v23, %v478_v50 }
 0x134   :  { %510 = vst.msk [vmem:[#allocation4] sm:$0xe] %vm509_vm5, %v495_v57  ;;  %v503_v18 = vrot.slane %v2536_v58, 7  ;;  %v480_v21 = vpack.c.bf16 %v477_v20, %v476_v19  ;;  %v2534_v54 = vpack.c.bf16 %v477_v20, %v477_v20  ;;  %v496_v55 = vrot.slane %v495_v57, 4 }
 0x136   :  { %v504_v22 = vsel %vm3465_vm6, %v502_v53, %v503_v18  ;;  %v497_v52 = vrot.slane %v2534_v54, 7  ;;  %2591 = vmatprep.mubr.msk.bf16.mxu0 %vm531_vm8, %v480_v21  ;;  %v680_v18 = vrot.slane %v2629_v49, 2  ;;  %v2358_v49 = vld [vmem:[#allocation10] ss:$0 sm:$0xff] }
 0x137   :  { %514 = vst.msk [vmem:[#allocation4 + $0xc] sm:$0xf] %vm511_vm7, %v504_v22  ;;  %2592 = vmatmul.mubr.msk.bf16.vlgmr.msra.gmra.mxu0 %vm531_vm8, %v481_v26 }
 0x138   :  { %v498_v24 = vsel %vm3465_vm6, %v496_v55, %v497_v52  ;;  %v499_v17 = vrot.slane %v497_v52, 4 }
 0x139   :  { %512 = vst.msk [vmem:[#allocation4 + $0x4] sm:$0xf] %vm511_vm7, %v498_v24 }
 0x13a   :  { %v501_v58 = vsel %vm3465_vm6, %v499_v17, %v500_v56 }
 0x13b   :  { %513 = vst.msk [vmem:[#allocation4 + $0x8] sm:$0xf] %vm511_vm7, %v501_v58 }
 0x140   :  { %v2624_v23 = vld [vmem:[#allocation4] sm:$0xff]  }
 0x141   :  { %v2627_v50 = vld [vmem:[#allocation4] sm:$0xfc]   ;;  %2597 = vmatprep.mubr.msk.bf16.mxu1 %vm531_vm8, %v2624_v23  ;;  %v2768_v23 = vmov 1966171168  }
 0x142   :  { %v2626_v57 = vld [vmem:[#allocation4 + $0x8] sm:$0x7f]   ;;  %v677_v26 = vrot.slane %v2627_v50, 2 }
 0x143   :  { %v2628_v19 = vld [vmem:[#allocation4 + $0x8] sm:$0xff]   ;;  %2598 = vmatmul.mubr.msk.bf16.vlgmr.msra.gmra.mxu1 %vm531_vm8, %v2626_v57 }
 0x144   :  { %2602 = vmatpush3.bf16.msra.mxu1 %v2625_v51  ;;  %v678_v20 = vrot.slane %v2628_v19, 2  ;;  %v768_v51 = vunpack.c.l.s4 %v2768_v23  ;;  %v770_v19 = vlaneseq }
 0x146   :  { %v679_v53 = vsel %vm676_vm9, %v677_v26, %v678_v20  ;;  %v681_v25 = vsel %vm676_vm9, %v678_v20, %v680_v18  ;;  %v769_v59 = vunpack.c.0.s8 %v768_v51  ;;  %v3481_v61 = vshrl.u32 %v770_v19, 7 }
 0x147   :  { %2603 = vmatprep.mubr.msk.bf16.mxu1 %vm531_vm8, %v679_v53 }
 0x14b   :  { %2604 = vmatmul.mubr.msk.bf16.vlgmr.msra.gmra.mxu1 %vm531_vm8, %v681_v25 }
 0x1f7   :  { %v2593_v56 = vpop.f32.mrf.mxu0 }
 0x1f9   :  { %v572_v22 = vpop.f32.mrf.mxu0 }
 0x1fb   :  { %v2594_v17 = vpop.f32.mrf.mxu0 }
 0x1fd   :  { %v575_v18 = vpop.f32.mrf.mxu0 }
 0x203   :  { %v2599_v21 = vpop.f32.mrf.mxu1 }
 0x204   :  { %v652_v24 = vadd.f32 %v2599_v21, %v2593_v56 }
 0x205   :  { %v643_v54 = vpop.f32.mrf.mxu1 }
 0x206   :  { %v644_v50 = vadd.f32 %v643_v54, %v572_v22 }
 0x207   :  { %v2600_v55 = vpop.f32.mrf.mxu1 }
 0x208   :  { %v655_v53 = vadd.f32 %v2600_v55, %v2594_v17 }
 0x209   :  { %v646_v52 = vpop.f32.mrf.mxu1 }
 0x20a   :  { %v647_v60 = vadd.f32 %v646_v52, %v575_v18 }
 0x20b   :  { %v2605_v58 = vpop.f32.mrf.mxu1 }
 0x20c   :  { %v745_v57 = vadd.f32 %v2605_v58, %v652_v24  ;;  %v3484_v24 = vsub.s32 %v769_v59, %v3481_v61 }
 0x20d   :  { %v728_v26 = vpop.f32.mrf.mxu1 }
 0x20e   :  { %v743_v20 = vadd.f32 %v728_v26, %v644_v50  ;;  %v756_v27 = vadd.f32 %v2358_v49, %v745_v57 }
 0x20f   :  { %v2606_v25 = vpop.f32.mrf.mxu1 }
 0x210   :  { %v746_v28 = vadd.f32 %v2606_v25, %v655_v53  ;;  %v754_v21 = vadd.f32 %v2358_v49, %v743_v20  ;;  %v760_v23 = vmax.f32 %v756_v27, 0.0 }
 0x211   :  { %v731_v56 = vpop.f32.mrf.mxu1 }
 0x212   :  { %v757_v62 = vadd.f32 %v2358_v49, %v746_v28  ;;  %v744_v29 = vadd.f32 %v731_v56, %v647_v60  ;;  %v758_v55 = vmax.f32 %v754_v21, 0.0 }
 0x214   :  { %v761_v54 = vmax.f32 %v757_v62, 0.0  ;;  %v755_v22 = vadd.f32 %v2358_v49, %v744_v29 }
 0x216   :  { %v763_v17 = vpack.c.bf16 %v761_v54, %v760_v23  ;;  %v2360_v58 = vpack.c.bf16 %v761_v54, %v761_v54  ;;  %v759_v51 = vmax.f32 %v755_v22, 0.0 }
 0x218   :  { %v762_v52 = vpack.c.bf16 %v759_v51, %v758_v55  ;;  %v2359_v50 = vpack.c.bf16 %v759_v51, %v759_v51  ;;  %v847_v57 = vrot.slane %v763_v17, %v3484_v24  ;;  %v882_v19 = vrot.slane %v2360_v58, %v3484_v24  ;;  %839 = vst.msk [vmem:[#allocation5 + $0x4] sm:$0x1] %vm764_vm10, %v763_v17 }
 0x21a   :  { %v848_v28 = vcombine.high %v847_v57, %v847_v57  ;;  %v809_v27 = vrot.slane %v2359_v50, %v3484_v24  ;;  %v773_v29 = vrot.slane %v762_v52, %v3484_v24  ;;  %765 = vst.msk [vmem:[#allocation5] sm:$0x1] %vm764_vm10, %v762_v52  ;;  %v855_v59 = vrot.slane %v847_v57, %v3484_v24 }
 0x21b   :  { %v889_v60 = vrot.slane %v882_v19, %v3484_v24 }
 0x21c   :  { %v862_v62 = vrot.slane %v848_v28, %v3484_v24  ;;  %v819_v49 = vcombine.high %v809_v27, %v809_v27  ;;  %v774_v26 = vcombine.high %v773_v29, %v773_v29  ;;  %v816_v53 = vrot.slane %v809_v27, %v3484_v24 }
 0x21d   :  { %v781_v20 = vrot.slane %v773_v29, %v3484_v24  ;;  %v867_v18 = vcombine.high %v855_v59, %v855_v59  ;;  %891 = vst.msk [vmem:[#allocation5 + $0x6] sm:$0x1] %vm764_vm10, %v889_v60  ;;  %v904_v25 = vcombine.high %v889_v60, %v889_v60 }
 0x21e   :  { %863 = vrot.lane.b32.xlu0 %v862_v62, %s2764_s22  ;;  %v826_v56 = vrot.slane %v819_v49, %v3484_v24 }
 0x21f   :  { %2754 = shalt.err (!%p2751_p0)  }
 0x220   :  { %355 = dma.hbm_to_vmem [thread:$0]  %s3854_s7, 4096, %s353_s2, [#allocation6 + $0x1]  ;;  %818 = vst.msk [vmem:[#allocation5 + $0x2] sm:$0x1] %vm764_vm10, %v816_v53  ;;  %v831_v21 = vcombine.high %v816_v53, %v816_v53  ;;  %v794_v23 = vcombine.high %v781_v20, %v781_v20  ;;  %869 = vst.msk [vmem:[#allocation5 + $0x5] sm:$0x1] %vm764_vm10, %v867_v18  ;;  %827 = vrot.lane.b32.xlu1 %v826_v56, %s2764_s22  ;;  %v788_v54 = vrot.slane %v774_v26, %v3484_v24 }
 0x221   :  { %906 = vst.msk [vmem:[#allocation5 + $0x7] sm:$0x1] %vm764_vm10, %v904_v25  ;;  %v834_v22 = vcombine.high %v826_v56, %v826_v56  ;;  %v892_v17 = vcombine.high %v882_v19, %v882_v19  ;;  %v870_v58 = vcombine.high %v862_v62, %v862_v62  ;;  %vm792_vm11 = vcmask 1040896  }
 0x222   :  { %833 = vst.msk [vmem:[#allocation5 + $0x3] sm:$0x1] %vm764_vm10, %v831_v21  ;;  %796 = vst.msk [vmem:[#allocation5 + $0x1] sm:$0x1] %vm764_vm10, %v794_v23  ;;  %789 = vrot.lane.b32.xlu0 %v788_v54, %s2764_s22  ;;  %v797_v55 = vcombine.high %v788_v54, %v788_v54  ;;  %v2376_v59 = vcombine.high %v2914_v15, %v2919_v16  ;;  %v2375_v60 = vcombine.low %v2914_v15, %v2919_v16 }
 0x223   :  { %v899_v51 = vrot.slane %v892_v17, %v3484_v24  ;;  %v2408_v62 = vcombine.high %v3074_v47, %v3079_v48  ;;  %v2407_v49 = vcombine.low %v3074_v47, %v3079_v48 }
 0x224   :  { %835 = vrot.lane.b32.xlu1 %v834_v22, %s2764_s22 }
 0x226   :  { %798 = vrot.lane.b32.xlu0 %v797_v55, %s2764_s22 }
 0x228   :  { %871 = vrot.lane.b32.xlu1 %v870_v58, %s2764_s22 }
 0x22a   :  { %900 = vrot.lane.b32.xlu0 %v899_v51, %s2764_s22 }
 0x290   :  { %v864_v52 = vpop.permute.xlu0 %863 }
 0x291   :  { %866 = vst.msk [vmem:[#allocation5 + $0x4] sm:$0x1] %vm792_vm11, %v864_v52 }
 0x292   :  { %v828_v50 = vpop.permute.xlu1 %827 }
 0x293   :  { %830 = vst.msk [vmem:[#allocation5 + $0x2] sm:$0x1] %vm792_vm11, %v828_v50 }
 0x294   :  { %v790_v57 = vpop.permute.xlu0 %789 }
 0x295   :  { %793 = vst.msk [vmem:[#allocation5] sm:$0x1] %vm792_vm11, %v790_v57 }
 0x296   :  { %v836_v28 = vpop.permute.xlu1 %835 }
 0x297   :  { %838 = vst.msk [vmem:[#allocation5 + $0x3] sm:$0x1] %vm792_vm11, %v836_v28 }
 0x298   :  { %v799_v27 = vpop.permute.xlu0 %798 }
 0x299   :  { %801 = vst.msk [vmem:[#allocation5 + $0x1] sm:$0x1] %vm792_vm11, %v799_v27 }
 0x29a   :  { %v872_v19 = vpop.permute.xlu1 %871 }
 0x29b   :  { %874 = vst.msk [vmem:[#allocation5 + $0x5] sm:$0x1] %vm792_vm11, %v872_v19 }
 0x29c   :  { %v901_v29 = vpop.permute.xlu0 %900 }
 0x29d   :  { %903 = vst.msk [vmem:[#allocation5 + $0x6] sm:$0x1] %vm792_vm11, %v901_v29 }
 0x29e   :  { %2759 = dma.done.wait [#allocation6], 15360 }
 0x29f   :  { %2760 = vsyncadd [#allocation6], 4294951936  ;;  %v2374_v26 = vcombine.high %v2904_v13, %v2909_v14  ;;  %v2406_v53 = vcombine.high %v3064_v45, %v3069_v46  ;;  %1705 = vmatprep.subr.bf16.mxu0 %v2376_v59  ;;  %1746 = vmatprep.subr.bf16.mxu1 %v2408_v62  ;;  %v2373_v15 = vcombine.low %v2904_v13, %v2909_v14  ;;  %v4033_v58 = vld [vmem:[#allocation44_spill] sm:$0xff]  ;;  %v4035_v57 = vld [vmem:[#allocation29_spill] sm:$0xff]  ;;  %vm1701_vm12 = vcmask 523264  }
 0x2a0   :  { %1706 = vmatpush1.bf16.msra.mxu0 %v2375_v60  ;;  %1747 = vmatpush1.bf16.msra.mxu1 %v2407_v49  ;;  %v2405_v16 = vcombine.low %v3064_v45, %v3069_v46  ;;  %v2372_v47 = vcombine.high %v2894_v11, %v2899_v12  ;;  %v2404_v48 = vcombine.high %v3054_v43, %v3059_v44  ;;  %v4036_v27 = vld [vmem:[#allocation43_spill] sm:$0xff]  ;;  %v4037_v19 = vld [vmem:[#allocation42_spill] sm:$0xff]  ;;  %v4038_v62 = vld [vmem:[#allocation28_spill] sm:$0xff] }
 0x2a1   :  { %1707 = vmatprep.subr.bf16.mxu0 %v2374_v26  ;;  %1748 = vmatprep.subr.bf16.mxu1 %v2406_v53  ;;  %v2371_v20 = vcombine.low %v2894_v11, %v2899_v12  ;;  %v2403_v18 = vcombine.low %v3054_v43, %v3059_v44  ;;  %v2370_v13 = vcombine.high %v2884_v9, %v2889_v10  ;;  %v4039_v49 = vld [vmem:[#allocation27_spill] sm:$0xff]  ;;  %v4040_v53 = vld [vmem:[#allocation41_spill] sm:$0xff] }
 0x2a2   :  { %v2402_v14 = vcombine.high %v3044_v41, %v3049_v42  ;;  %v2369_v45 = vcombine.low %v2884_v9, %v2889_v10  ;;  %v2401_v46 = vcombine.low %v3044_v41, %v3049_v42  ;;  %v2368_v11 = vcombine.high %v2874_v7, %v2879_v8 }
 0x2a3   :  { %v2400_v12 = vcombine.high %v3034_v39, %v3039_v40  ;;  %v2367_v43 = vcombine.low %v2874_v7, %v2879_v8  ;;  %v2399_v44 = vcombine.low %v3034_v39, %v3039_v40  ;;  %v2366_v10 = vcombine.high %v2864_v5, %v2869_v6 }
 0x2a4   :  { %1708 = vmatpush1.bf16.msra.mxu0 %v2373_v15  ;;  %1749 = vmatpush1.bf16.msra.mxu1 %v2405_v16  ;;  %v3556_v9 = vld [vmem:[#allocation5] sm:$0xff]  ;;  %v2398_v41 = vcombine.high %v3024_v37, %v3029_v38  ;;  %v2365_v7 = vcombine.low %v2864_v5, %v2869_v6  ;;  %v2397_v8 = vcombine.low %v3024_v37, %v3029_v38 }
 0x2a5   :  { %1709 = vmatprep.subr.bf16.mxu0 %v2372_v47  ;;  %1750 = vmatprep.subr.bf16.mxu1 %v2404_v48  ;;  %v3564_v42 = vrot.slane %v3556_v9, %v3484_v24  ;;  %v2364_v39 = vcombine.high %v2854_v3, %v2859_v4  ;;  %v2396_v40 = vcombine.high %v3014_v35, %v3019_v36  ;;  %v4041_v15 = vld [vmem:[#allocation40_spill] sm:$0xff] }
 0x2a6   :  { %v2363_v5 = vcombine.low %v2854_v3, %v2859_v4  ;;  %v2395_v6 = vcombine.low %v3014_v35, %v3019_v36  ;;  %v2362_v37 = vcombine.high %v2844_v1, %v2849_v2  ;;  %v2394_v38 = vcombine.high %v3004_v33, %v3009_v34 }
 0x2a7   :  { %v1060_v25 = vcombine.high %v3564_v42, %v3564_v42  ;;  %v2361_v23 = vcombine.low %v2844_v1, %v2849_v2  ;;  %v2393_v3 = vcombine.low %v3004_v33, %v3009_v34  ;;  %v2392_v4 = vcombine.high %v2994_v31, %v2999_v32  ;;  %v4027_v1 = vld [vmem:[#allocation33_spill] sm:$0xff]  ;;  %v4028_v33 = vld [vmem:[#allocation47_spill] sm:$0xff]  ;;  %v4029_v34 = vld [vmem:[#allocation46_spill] sm:$0xff] }
 0x2a8   :  { %1710 = vmatpush1.bf16.msra.mxu0 %v2371_v20  ;;  %1751 = vmatpush1.bf16.msra.mxu1 %v2403_v18  ;;  %v2424_v35 = vcombine.high %v3154_v63, %v3159_v0  ;;  %v2391_v36 = vcombine.low %v2994_v31, %v2999_v32  ;;  %v2423_v54 = vcombine.low %v3154_v63, %v3159_v0  ;;  %v4030_v31 = vld [vmem:[#allocation32_spill] sm:$0xff]  ;;  %v4031_v32 = vld [vmem:[#allocation31_spill] sm:$0xff]  ;;  %v4032_v0 = vld [vmem:[#allocation45_spill] sm:$0xff] }
 0x2a9   :  { %1711 = vmatprep.subr.bf16.mxu0 %v2370_v13  ;;  %1752 = vmatprep.subr.bf16.mxu1 %v2402_v14  ;;  %v1082_v56 = vrot.slane %v1060_v25, %v3484_v24  ;;  %v2390_v2 = vcombine.high %v4027_v1, %v2989_v30  ;;  %v2422_v22 = vcombine.high %v4029_v34, %v4028_v33  ;;  %v4042_v20 = vld [vmem:[#allocation26_spill] sm:$0xff]  ;;  %v4043_v18 = vld [vmem:[#allocation25_spill] sm:$0xff]  ;;  %v4044_v14 = vld [vmem:[#allocation39_spill] sm:$0xff] }
 0x2aa   :  { %v2389_v55 = vcombine.low %v4027_v1, %v2989_v30  ;;  %v2421_v17 = vcombine.low %v4029_v34, %v4028_v33  ;;  %v2388_v63 = vcombine.high %v4031_v32, %v4030_v31  ;;  %v2420_v51 = vcombine.high %v4033_v58, %v4032_v0  ;;  %v4034_v30 = vld [vmem:[#allocation30_spill] sm:$0xff] }
 0x2ab   :  { %v1092_v21 = vcombine.high %v1082_v56, %v1082_v56  ;;  %1737 = vmatprep.mubr.bf16.mxu0 %v1082_v56  ;;  %v2387_v52 = vcombine.low %v4031_v32, %v4030_v31  ;;  %v2419_v50 = vcombine.low %v4033_v58, %v4032_v0  ;;  %v2386_v28 = vcombine.high %v4035_v57, %v4034_v30  ;;  %v4050_v56 = vld [vmem:[#allocation22_spill] sm:$0xff]  ;;  %v4058_v31 = vld [vmem:[#allocation61_spill] sm:$0xff]  ;;  %v4059_v32 = vld [vmem:[#allocation60_spill] sm:$0xff] }
 0x2ac   :  { %1712 = vmatpush1.bf16.msra.mxu0 %v2369_v45  ;;  %1753 = vmatpush1.bf16.msra.mxu1 %v2401_v46  ;;  %v2418_v29 = vcombine.high %v4037_v19, %v4036_v27  ;;  %v2385_v59 = vcombine.low %v4035_v57, %v4034_v30  ;;  %v2417_v60 = vcombine.low %v4037_v19, %v4036_v27  ;;  %v4045_v45 = vld [vmem:[#allocation38_spill] sm:$0xff]  ;;  %v4060_v0 = vld [vmem:[#allocation93_spill] sm:$0xff]  ;;  %v4061_v58 = vld [vmem:[#allocation92_spill] sm:$0xff] }
 0x2ad   :  { %1713 = vmatprep.subr.bf16.mxu0 %v2368_v11  ;;  %1754 = vmatprep.subr.bf16.mxu1 %v2400_v12  ;;  %v2384_v26 = vcombine.high %v4039_v49, %v4038_v62  ;;  %v2416_v16 = vcombine.high %v4041_v15, %v4040_v53  ;;  %v2383_v47 = vcombine.low %v4039_v49, %v4038_v62  ;;  %v4057_v33 = vld [vmem:[#allocation94_spill] sm:$0xff]  ;;  %v4062_v57 = vld [vmem:[#allocation59_spill] sm:$0xff]  ;;  %v4066_v49 = vld [vmem:[#allocation57_spill] sm:$0xff] }
 0x2ae   :  { %1778 = vmatprep.mubr.bf16.mxu1 %v1092_v21  ;;  %v2415_v48 = vcombine.low %v4041_v15, %v4040_v53  ;;  %v2382_v13 = vcombine.high %v4043_v18, %v4042_v20  ;;  %v2414_v46 = vcombine.high %v4045_v45, %v4044_v14  ;;  %v1045_v11 = vcombine.high %v3556_v9, %v3556_v9  ;;  %v4064_v19 = vld [vmem:[#allocation91_spill] sm:$0xff]  ;;  %v4068_v15 = vld [vmem:[#allocation89_spill] sm:$0xff] }
 0x2af   :  { %v2381_v12 = vcombine.low %v4043_v18, %v4042_v20  ;;  %v2469_v30 = vcombine.low %v4061_v58, %v4060_v0  ;;  %v4070_v18 = vld [vmem:[#allocation55_spill] sm:$0xff] }
 0x2b0   :  { %1714 = vmatpush1.bf16.msra.mxu0 %v2367_v43  ;;  %1755 = vmatpush1.bf16.msra.mxu1 %v2399_v44  ;;  %v2413_v43 = vcombine.low %v4045_v45, %v4044_v14  ;;  %v4046_v44 = vld [vmem:[#allocation24_spill] sm:$0xff]  ;;  %v4072_v45 = vld [vmem:[#allocation87_spill] sm:$0xff] }
 0x2b1   :  { %1715 = vmatprep.subr.bf16.mxu0 %v2366_v10  ;;  %1756 = vmatprep.subr.bf16.mxu1 %v2398_v41  ;;  %v4047_v10 = vld [vmem:[#allocation23_spill] sm:$0xff] }
 0x2b2   :  { %v2380_v41 = vcombine.high %v4047_v10, %v4046_v44  ;;  %v2379_v9 = vcombine.low %v4047_v10, %v4046_v44  ;;  %v4074_v44 = vld [vmem:[#allocation53_spill] sm:$0xff]  ;;  %v4075_v10 = vld [vmem:[#allocation52_spill] sm:$0xff] }
 0x2b4   :  { %1716 = vmatpush1.bf16.msra.mxu0 %v2365_v7  ;;  %1757 = vmatpush1.bf16.msra.mxu1 %v2397_v8  ;;  %v4048_v7 = vld [vmem:[#allocation37_spill] sm:$0xff]  ;;  %v4049_v8 = vld [vmem:[#allocation36_spill] sm:$0xff] }
 0x2b5   :  { %1717 = vmatprep.subr.bf16.mxu0 %v2364_v39  ;;  %1758 = vmatprep.subr.bf16.mxu1 %v2396_v40  ;;  %v2412_v39 = vcombine.high %v4049_v8, %v4048_v7  ;;  %v3644_v40 = vrot.slane %v1045_v11, %v3484_v24  ;;  %v2411_v25 = vcombine.low %v4049_v8, %v4048_v7  ;;  %v4076_v7 = vld [vmem:[#allocation85_spill] sm:$0xff]  ;;  %v4077_v8 = vld [vmem:[#allocation84_spill] sm:$0xff] }
 0x2b8   :  { %1718 = vmatpush1.bf16.msra.mxu0 %v2363_v5  ;;  %1759 = vmatpush1.bf16.msra.mxu1 %v2395_v6  ;;  %v4051_v5 = vld [vmem:[#allocation21_spill] sm:$0xff] }
 0x2b9   :  { %1719 = vmatprep.subr.bf16.mxu0 %v2362_v37  ;;  %1760 = vmatprep.subr.bf16.mxu1 %v2394_v38  ;;  %v2378_v6 = vcombine.high %v4051_v5, %v4050_v56  ;;  %v4052_v37 = vld [vmem:[#allocation35_spill] sm:$0xff]  ;;  %v4053_v38 = vld [vmem:[#allocation34_spill] sm:$0xff] }
 0x2ba   :  { %v2410_v21 = vcombine.high %v4053_v38, %v4052_v37 }
 0x2bc   :  { %1720 = vmatpush1.bf16.msra.mxu0 %v2361_v23  ;;  %1761 = vmatpush1.bf16.msra.mxu1 %v2393_v3  ;;  %v1061_v23 = vcombine.high %v3644_v40, %v3644_v40  ;;  %v1068_v3 = vrot.slane %v3564_v42, %v3484_v24 }
 0x2bd   :  { %1721 = vmatprep.subr.bf16.mxu0 %v2392_v4  ;;  %1762 = vmatprep.subr.bf16.mxu1 %v2424_v35  ;;  %v2377_v4 = vcombine.low %v4051_v5, %v4050_v56  ;;  %v2409_v35 = vcombine.low %v4053_v38, %v4052_v37  ;;  %v4078_v56 = vld [vmem:[#allocation51_spill] sm:$0xff]  ;;  %v4079_v5 = vld [vmem:[#allocation50_spill] sm:$0xff] }
 0x2be   :  { %v4080_v37 = vld [vmem:[#allocation83_spill] sm:$0xff]  ;;  %v4081_v38 = vld [vmem:[#allocation82_spill] sm:$0xff] }
 0x2c0   :  { %1722 = vmatpush2.bf16.msra.mxu0 %v2391_v36  ;;  %1763 = vmatpush2.bf16.msra.mxu1 %v2423_v54  ;;  %v4054_v36 = vld [vmem:[#allocation63_spill] sm:$0xff]  ;;  %v4055_v54 = vld [vmem:[#allocation62_spill] sm:$0xff] }
 0x2c1   :  { %1723 = vmatprep.subr.bf16.mxu0 %v2390_v2  ;;  %1764 = vmatprep.subr.bf16.mxu1 %v2422_v22  ;;  %v2440_v1 = vcombine.high %v4055_v54, %v4054_v36  ;;  %v4056_v2 = vld [vmem:[#allocation95_spill] sm:$0xff]  ;;  %v1089_v22 = vrot.slane %v1061_v23, %v3484_v24  ;;  %v2439_v42 = vcombine.low %v4055_v54, %v4054_v36  ;;  %v4084_v54 = vld [vmem:[#allocation81_spill] sm:$0xff] }
 0x2c2   :  { %v2472_v34 = vcombine.high %v4057_v33, %v4056_v2  ;;  %v2427_v23 = vcombine.low %v4079_v5, %v4078_v56 }
 0x2c4   :  { %1724 = vmatpush2.bf16.msra.mxu0 %v2389_v55  ;;  %1765 = vmatpush2.bf16.msra.mxu1 %v2421_v17  ;;  %v1090_v55 = vcombine.high %v1068_v3, %v1068_v3  ;;  %v2471_v17 = vcombine.low %v4057_v33, %v4056_v2 }
 0x2c5   :  { %1725 = vmatprep.subr.bf16.mxu0 %v2388_v63  ;;  %1766 = vmatprep.subr.bf16.mxu1 %v2420_v51  ;;  %v2438_v63 = vcombine.high %v4059_v32, %v4058_v31  ;;  %v2470_v51 = vcombine.high %v4061_v58, %v4060_v0  ;;  %v4090_v58 = vld [vmem:[#allocation77_spill] sm:$0xff] }
 0x2c8   :  { %1726 = vmatpush2.bf16.msra.mxu0 %v2387_v52  ;;  %1767 = vmatpush2.bf16.msra.mxu1 %v2419_v50  ;;  %v1093_v52 = vcombine.high %v1089_v22, %v1089_v22  ;;  %v2437_v50 = vcombine.low %v4059_v32, %v4058_v31  ;;  %v4089_v31 = vld [vmem:[#allocation102_spill] sm:$0xff] }
 0x2c9   :  { %1727 = vmatprep.subr.bf16.mxu0 %v2386_v28  ;;  %1768 = vmatprep.subr.bf16.mxu1 %v2418_v29  ;;  %v4063_v28 = vld [vmem:[#allocation58_spill] sm:$0xff] }
 0x2ca   :  { %v2436_v27 = vcombine.high %v4063_v28, %v4062_v57  ;;  %v4065_v29 = vld [vmem:[#allocation90_spill] sm:$0xff] }
 0x2cb   :  { %v2467_v62 = vcombine.low %v4065_v29, %v4064_v19 }
 0x2cc   :  { %1728 = vmatpush2.bf16.msra.mxu0 %v2385_v59  ;;  %1769 = vmatpush2.bf16.msra.mxu1 %v2417_v60  ;;  %v2468_v59 = vcombine.high %v4065_v29, %v4064_v19  ;;  %v2435_v60 = vcombine.low %v4063_v28, %v4062_v57  ;;  %v4094_v19 = vld [vmem:[#allocation75_spill] sm:$0xff]  ;;  %v4095_v29 = vld [vmem:[#allocation74_spill] sm:$0xff] }
 0x2cd   :  { %1729 = vmatprep.subr.bf16.mxu0 %v2384_v26  ;;  %1770 = vmatprep.subr.bf16.mxu1 %v2416_v16  ;;  %v4067_v26 = vld [vmem:[#allocation56_spill] sm:$0xff] }
 0x2ce   :  { %v2434_v53 = vcombine.high %v4067_v26, %v4066_v49  ;;  %v4069_v16 = vld [vmem:[#allocation88_spill] sm:$0xff] }
 0x2cf   :  { %v2465_v20 = vcombine.low %v4069_v16, %v4068_v15 }
 0x2d0   :  { %1730 = vmatpush2.bf16.msra.mxu0 %v2383_v47  ;;  %1771 = vmatpush2.bf16.msra.mxu1 %v2415_v48  ;;  %v2466_v47 = vcombine.high %v4069_v16, %v4068_v15  ;;  %v2433_v48 = vcombine.low %v4067_v26, %v4066_v49  ;;  %v2451_v26 = vcombine.low %v4095_v29, %v4094_v19  ;;  %v4098_v15 = vld [vmem:[#allocation73_spill] sm:$0xff]  ;;  %v4099_v16 = vld [vmem:[#allocation72_spill] sm:$0xff] }
 0x2d1   :  { %1731 = vmatprep.subr.bf16.mxu0 %v2382_v13  ;;  %1772 = vmatprep.subr.bf16.mxu1 %v2414_v46  ;;  %v4071_v13 = vld [vmem:[#allocation54_spill] sm:$0xff] }
 0x2d2   :  { %v2432_v14 = vcombine.high %v4071_v13, %v4070_v18  ;;  %v4073_v46 = vld [vmem:[#allocation86_spill] sm:$0xff] }
 0x2d3   :  { %v2464_v11 = vcombine.high %v4073_v46, %v4072_v45 }
 0x2d4   :  { %1732 = vmatpush2.bf16.msra.mxu0 %v2381_v12  ;;  %1773 = vmatpush2.bf16.msra.mxu1 %v2413_v43  ;;  %v2431_v12 = vcombine.low %v4071_v13, %v4070_v18  ;;  %v2463_v43 = vcombine.low %v4073_v46, %v4072_v45  ;;  %v1075_v13 = vrot.slane %v3644_v40, %v3484_v24  ;;  %v4102_v46 = vld [vmem:[#allocation71_spill] sm:$0xff]  ;;  %v4104_v24 = vld [vmem:[#allocation69_spill] sm:$0xff]  ;;  %v4105_v40 = vld [vmem:[#allocation68_spill] sm:$0xff] }
 0x2d5   :  { %1733 = vmatprep.subr.bf16.mxu0 %v2380_v41  ;;  %1774 = vmatprep.subr.bf16.mxu1 %v2412_v39  ;;  %v2430_v41 = vcombine.high %v4075_v10, %v4074_v44  ;;  %v2462_v39 = vcombine.high %v4077_v8, %v4076_v7 }
 0x2d8   :  { %1734 = vmatpush2.bf16.msra.mxu0 %v2379_v9  ;;  %1775 = vmatpush2.bf16.msra.mxu1 %v2411_v25  ;;  %v2429_v9 = vcombine.low %v4075_v10, %v4074_v44  ;;  %v2461_v25 = vcombine.low %v4077_v8, %v4076_v7  ;;  %v2446_v10 = vcombine.high %v4105_v40, %v4104_v24  ;;  %v4106_v7 = vld [vmem:[#allocation67_spill] sm:$0xff]  ;;  %v4107_v8 = vld [vmem:[#allocation66_spill] sm:$0xff] }
 0x2d9   :  { %1735 = vmatprep.subr.bf16.mxu0 %v2378_v6  ;;  %1776 = vmatprep.subr.bf16.mxu1 %v2410_v21  ;;  %v2428_v6 = vcombine.high %v4079_v5, %v4078_v56  ;;  %v2460_v21 = vcombine.high %v4081_v38, %v4080_v37  ;;  %v4109_v56 = vld [vmem:[#allocation64_spill] sm:$0xff] }
 0x2dc   :  { %1736 = vmatpush2.bf16.msra.mxu0 %v2377_v4  ;;  %1777 = vmatpush2.bf16.msra.mxu1 %v2409_v35  ;;  %v4082_v4 = vld [vmem:[#allocation49_spill] sm:$0xff]  ;;  %v4083_v35 = vld [vmem:[#allocation48_spill] sm:$0xff] }
 0x2dd   :  { %1787 = vmatprep.subr.bf16.mxu0 %v2440_v1  ;;  %1828 = vmatprep.subr.bf16.mxu1 %v2472_v34  ;;  %v2426_v36 = vcombine.high %v4083_v35, %v4082_v4  ;;  %v4085_v1 = vld [vmem:[#allocation80_spill] sm:$0xff]  ;;  %v2425_v33 = vcombine.low %v4083_v35, %v4082_v4 }
 0x2de   :  { %v2458_v2 = vcombine.high %v4085_v1, %v4084_v54  ;;  %v2457_v34 = vcombine.low %v4085_v1, %v4084_v54 }
 0x2df   :  { %1738 = vmatmul.mubr.bf16.vlgmr.msra.gmra.mxu0 %v1068_v3  ;;  %1779 = vmatmul.mubr.bf16.vlgmr.msra.gmra.mxu1 %v1090_v55  ;;  %v2459_v3 = vcombine.low %v4081_v38, %v4080_v37  ;;  %v4087_v55 = vld [vmem:[#allocation78_spill] sm:$0xff] }
 0x2e0   :  { %1788 = vmatpush1.bf16.msra.mxu0 %v2439_v42  ;;  %1829 = vmatpush1.bf16.msra.mxu1 %v2471_v17  ;;  %v4088_v17 = vld [vmem:[#allocation103_spill] sm:$0xff] }
 0x2e1   :  { %1789 = vmatprep.subr.bf16.mxu0 %v2438_v63  ;;  %1830 = vmatprep.subr.bf16.mxu1 %v2470_v51  ;;  %v2480_v32 = vcombine.high %v4089_v31, %v4088_v17  ;;  %v2479_v0 = vcombine.low %v4089_v31, %v4088_v17  ;;  %v4091_v51 = vld [vmem:[#allocation76_spill] sm:$0xff] }
 0x2e2   :  { %2481 = vmatprep.mubr.msk.bf16.mxu1 %vm1701_vm12, %v1093_v52  ;;  %1819 = vmatprep.mubr.bf16.mxu0 %v1089_v22  ;;  %v4086_v22 = vld [vmem:[#allocation79_spill] sm:$0xff]  ;;  %v2454_v52 = vcombine.high %v4091_v51, %v4090_v58  ;;  %v2453_v28 = vcombine.low %v4091_v51, %v4090_v58 }
 0x2e3   :  { %v2456_v42 = vcombine.high %v4087_v55, %v4086_v22  ;;  %v2455_v63 = vcombine.low %v4087_v55, %v4086_v22  ;;  %v1040_v22 = vsub.s32 1, %v3481_v61 }
 0x2e4   :  { %1790 = vmatpush1.bf16.msra.mxu0 %v2437_v50  ;;  %1831 = vmatpush1.bf16.msra.mxu1 %v2469_v30  ;;  %v4092_v50 = vld [vmem:[#allocation101_spill] sm:$0xff]  ;;  %v4093_v30 = vld [vmem:[#allocation100_spill] sm:$0xff] }
 0x2e5   :  { %1791 = vmatprep.subr.bf16.mxu0 %v2436_v27  ;;  %1832 = vmatprep.subr.bf16.mxu1 %v2468_v59  ;;  %v2478_v57 = vcombine.high %v4093_v30, %v4092_v50  ;;  %v2477_v27 = vcombine.low %v4093_v30, %v4092_v50  ;;  %v2452_v59 = vcombine.high %v4095_v29, %v4094_v19 }
 0x2e8   :  { %1792 = vmatpush1.bf16.msra.mxu0 %v2435_v60  ;;  %1833 = vmatpush1.bf16.msra.mxu1 %v2467_v62  ;;  %v4096_v60 = vld [vmem:[#allocation99_spill] sm:$0xff]  ;;  %v4097_v62 = vld [vmem:[#allocation98_spill] sm:$0xff] }
 0x2e9   :  { %1793 = vmatprep.subr.bf16.mxu0 %v2434_v53  ;;  %1834 = vmatprep.subr.bf16.mxu1 %v2466_v47  ;;  %v2476_v49 = vcombine.high %v4097_v62, %v4096_v60  ;;  %v2475_v53 = vcombine.low %v4097_v62, %v4096_v60  ;;  %v2450_v47 = vcombine.high %v4099_v16, %v4098_v15 }
 0x2ec   :  { %1794 = vmatpush1.bf16.msra.mxu0 %v2433_v48  ;;  %1835 = vmatpush1.bf16.msra.mxu1 %v2465_v20  ;;  %v4100_v48 = vld [vmem:[#allocation97_spill] sm:$0xff]  ;;  %v4101_v20 = vld [vmem:[#allocation96_spill] sm:$0xff] }
 0x2ed   :  { %1795 = vmatprep.subr.bf16.mxu0 %v2432_v14  ;;  %1836 = vmatprep.subr.bf16.mxu1 %v2464_v11  ;;  %v2474_v18 = vcombine.high %v4101_v20, %v4100_v48  ;;  %v2449_v14 = vcombine.low %v4099_v16, %v4098_v15  ;;  %v2473_v45 = vcombine.low %v4101_v20, %v4100_v48  ;;  %v4103_v11 = vld [vmem:[#allocation70_spill] sm:$0xff] }
 0x2ee   :  { %v2447_v44 = vcombine.low %v4103_v11, %v4102_v46 }
 0x2f0   :  { %1796 = vmatpush1.bf16.msra.mxu0 %v2431_v12  ;;  %1837 = vmatpush1.bf16.msra.mxu1 %v2463_v43  ;;  %v2448_v12 = vcombine.high %v4103_v11, %v4102_v46  ;;  %v1091_v43 = vcombine.high %v1075_v13, %v1075_v13 }
 0x2f1   :  { %1797 = vmatprep.subr.bf16.mxu0 %v2430_v41  ;;  %1838 = vmatprep.subr.bf16.mxu1 %v2462_v39  ;;  %v2445_v41 = vcombine.low %v4105_v40, %v4104_v24  ;;  %v2444_v39 = vcombine.high %v4107_v8, %v4106_v7 }
 0x2f4   :  { %1798 = vmatpush1.bf16.msra.mxu0 %v2429_v9  ;;  %1839 = vmatpush1.bf16.msra.mxu1 %v2461_v25  ;;  %v2443_v9 = vcombine.low %v4107_v8, %v4106_v7  ;;  %v4108_v25 = vld [vmem:[#allocation65_spill] sm:$0xff] }
 0x2f5   :  { %1799 = vmatprep.subr.bf16.mxu0 %v2428_v6  ;;  %1840 = vmatprep.subr.bf16.mxu1 %v2460_v21  ;;  %v2442_v5 = vcombine.high %v4109_v56, %v4108_v25  ;;  %v2441_v6 = vcombine.low %v4109_v56, %v4108_v25 }
 0x2f8   :  { %1800 = vmatpush1.bf16.msra.mxu0 %v2427_v23  ;;  %1841 = vmatpush1.bf16.msra.mxu1 %v2459_v3 }
 0x2f9   :  { %1801 = vmatprep.subr.bf16.mxu0 %v2426_v36  ;;  %1842 = vmatprep.subr.bf16.mxu1 %v2458_v2  ;;  %v1036_v2 = vsub.s32 0, %v3481_v61 }
 0x2fc   :  { %1802 = vmatpush1.bf16.msra.mxu0 %v2425_v33  ;;  %1843 = vmatpush1.bf16.msra.mxu1 %v2457_v34  ;;  %v1032_v33 = vld [vmem:[%s3853_s6] sm:$0x3] }
 0x2fd   :  { %1803 = vmatprep.subr.bf16.mxu0 %v2456_v42  ;;  %1852 = vmatprep.subr.bf16.mxu1 %v2480_v32  ;;  %v1037_v42 = vrot.slane %v1032_v33, %v1036_v2  ;;  %v1041_v17 = vrot.slane %v1032_v33, %v1040_v22 }
 0x300   :  { %1804 = vmatpush2.bf16.msra.mxu0 %v2455_v63  ;;  %1853 = vmatpush2.bf16.msra.mxu1 %v2479_v0 }
 0x301   :  { %1805 = vmatprep.subr.bf16.mxu0 %v2454_v52  ;;  %1854 = vmatprep.subr.bf16.mxu1 %v2478_v57 }
 0x304   :  { %1806 = vmatpush2.bf16.msra.mxu0 %v2453_v28  ;;  %1855 = vmatpush2.bf16.msra.mxu1 %v2477_v27 }
 0x305   :  { %1807 = vmatprep.subr.bf16.mxu0 %v2452_v59  ;;  %1856 = vmatprep.subr.bf16.mxu1 %v2476_v49 }
 0x308   :  { %1808 = vmatpush2.bf16.msra.mxu0 %v2451_v26  ;;  %1857 = vmatpush2.bf16.msra.mxu1 %v2475_v53 }
 0x309   :  { %1809 = vmatprep.subr.bf16.mxu0 %v2450_v47  ;;  %1858 = vmatprep.subr.bf16.mxu1 %v2474_v18 }
 0x30c   :  { %1810 = vmatpush2.bf16.msra.mxu0 %v2449_v14  ;;  %1859 = vmatpush2.bf16.msra.mxu1 %v2473_v45 }
 0x30d   :  { %1811 = vmatprep.subr.bf16.mxu0 %v2448_v12 }
 0x30f   :  { %1861 = vmatmul.mubr.bf16.vlgmr.msra.gmra.mxu1 %v1091_v43 }
 0x310   :  { %1812 = vmatpush2.bf16.msra.mxu0 %v2447_v44 }
 0x311   :  { %1813 = vmatprep.subr.bf16.mxu0 %v2446_v10 }
 0x314   :  { %1814 = vmatpush2.bf16.msra.mxu0 %v2445_v41 }
 0x315   :  { %1815 = vmatprep.subr.bf16.mxu0 %v2444_v39 }
 0x318   :  { %1816 = vmatpush2.bf16.msra.mxu0 %v2443_v9 }
 0x319   :  { %1817 = vmatprep.subr.bf16.mxu0 %v2442_v5 }
 0x31c   :  { %1818 = vmatpush2.bf16.msra.mxu0 %v2441_v6 }
 0x31f   :  { %1820 = vmatmul.mubr.bf16.vlgmr.msra.gmra.mxu0 %v1075_v13 }
 0x39f   :  { %v1739_v37 = vpop.f32.mrf.mxu0  ;;  %v1780_v38 = vpop.f32.mrf.mxu1 }
 0x3a0   :  { %v1740_v31 = vadd.f32 %v1739_v37, %v1037_v42 }
 0x3a1   :  { %v1741_v21 = vpop.f32.mrf.mxu0  ;;  %v1782_v23 = vpop.f32.mrf.mxu1 }
 0x3a2   :  { %v1742_v32 = vadd.f32 %v1741_v21, %v1041_v17  ;;  %v1781_v63 = vadd.f32 %v1780_v38, %v1740_v31 }
 0x3a3   :  { %v1743_v3 = vpop.f32.mrf.mxu0  ;;  %v1784_v4 = vpop.f32.mrf.mxu1 }
 0x3a4   :  { %v1783_v58 = vadd.f32 %v1782_v23, %v1742_v32 }
 0x3a5   :  { %v1744_v35 = vpop.f32.mrf.mxu0  ;;  %v1785_v36 = vpop.f32.mrf.mxu1 }
 0x3cf   :  { %v1862_v54 = vpop.f32.mrf.mxu1 }
 0x3d1   :  { %v1864_v1 = vpop.f32.mrf.mxu1 }
 0x3d3   :  { %v1866_v34 = vpop.f32.mrf.mxu1 }
 0x3d5   :  { %v1867_v55 = vpop.f32.mrf.mxu1 }
 0x3df   :  { %v1821_v0 = vpop.f32.mrf.mxu0 }
 0x3e0   :  { %v1822_v51 = vadd.f32 %v1821_v0, %v1781_v63 }
 0x3e1   :  { %v1823_v52 = vpop.f32.mrf.mxu0 }
 0x3e2   :  { %v1863_v50 = vadd.f32 %v1862_v54, %v1822_v51  ;;  %v1824_v30 = vadd.f32 %v1823_v52, %v1783_v58 }
 0x3e3   :  { %v1825_v57 = vpop.f32.mrf.mxu0 }
 0x3e4   :  { %v1869_v28 = vmax.f32 %v1863_v50, 0.0  ;;  %v1865_v27 = vadd.f32 %v1864_v1, %v1824_v30 }
 0x3e5   :  { %v1826_v19 = vpop.f32.mrf.mxu0 }
 0x3e6   :  { %v3786_v29 = vpack.c.bf16 %v1869_v28, %v1869_v28  ;;  %v1870_v59 = vmax.f32 %v1865_v27, 0.0 }
 0x3e8   :  { %v1872_v60 = vpack.c.bf16 %v1870_v59, %v1870_v59 }
 0x3e9   :  { %2761 = dma.done.wait [#allocation6 + $0x1], 4096 }
 0x3ea   :  { %2762 = vsyncadd [#allocation6 + $0x1], 4294963200  ;;  %2113 = vmatprep.mubr.bf16.mxu1 %v1872_v60  ;;  %v2631_v62 = vld [vmem:[#allocation3 + $0x74] ss:$8 sps:$4 sm:$0xff]   ;;  %v2633_v49 = vld [vmem:[#allocation3 + $0x70] ss:$8 sps:$4 sm:$0xff]  }
 0x3eb   :  { %2081 = vmatprep.subr.bf16.mxu1 %v2631_v62  ;;  %v2634_v26 = vld [vmem:[#allocation3 + $0x64] ss:$8 sps:$4 sm:$0xff]   ;;  %v2636_v53 = vld [vmem:[#allocation3 + $0x60] ss:$8 sps:$4 sm:$0xff]   ;;  %v2637_v15 = vld [vmem:[#allocation3 + $0x54] ss:$8 sps:$4 sm:$0xff]  }
 0x3ec   :  { %2082 = vmatpush1.bf16.msra.mxu1 %v2633_v49  ;;  %v2639_v16 = vld [vmem:[#allocation3 + $0x50] ss:$8 sps:$4 sm:$0xff]   ;;  %v2640_v47 = vld [vmem:[#allocation3 + $0x44] ss:$8 sps:$4 sm:$0xff]   ;;  %v2642_v48 = vld [vmem:[#allocation3 + $0x40] ss:$8 sps:$4 sm:$0xff]  }
 0x3ed   :  { %2083 = vmatprep.subr.bf16.mxu1 %v2634_v26  ;;  %v2643_v20 = vld [vmem:[#allocation3 + $0x34] ss:$8 sps:$4 sm:$0xff]   ;;  %v2645_v18 = vld [vmem:[#allocation3 + $0x30] ss:$8 sps:$4 sm:$0xff]   ;;  %v2646_v13 = vld [vmem:[#allocation3 + $0x24] ss:$8 sps:$4 sm:$0xff]  }
 0x3ee   :  { %v2648_v14 = vld [vmem:[#allocation3 + $0x20] ss:$8 sps:$4 sm:$0xff]   ;;  %v2649_v45 = vld [vmem:[#allocation3 + $0x14] ss:$8 sps:$4 sm:$0xff]   ;;  %v2651_v46 = vld [vmem:[#allocation3 + $0x10] ss:$8 sps:$4 sm:$0xff]  }
 0x3ef   :  { %v2652_v11 = vld [vmem:[#allocation3 + $0x4] ss:$8 sps:$4 sm:$0xff]   ;;  %v2679_v12 = vld [vmem:[%s3856_s9 + $0x78] sm:$0xff]   ;;  %v2681_v44 = vld [vmem:[%s3856_s9 + $0x70] sm:$0xff]   ;;  %vm2301_vm13 = vcmask 1024  }
 0x3f0   :  { %2084 = vmatpush1.bf16.msra.mxu1 %v2636_v53  ;;  %v2680_v43 = vld [vmem:[%s3856_s9 + $0x38] sm:$0xff]   ;;  %2553 = vmatprep.subr.bf16.mxu0 %v2679_v12  ;;  %v2682_v24 = vld [vmem:[%s3856_s9 + $0x30] sm:$0xff]   ;;  %v2683_v40 = vld [vmem:[%s3856_s9 + $0x68] sm:$0xff]  }
 0x3f1   :  { %2085 = vmatprep.subr.bf16.mxu1 %v2637_v15  ;;  %2554 = vmatpush3.bf16.msra.mxu0 %v2680_v43  ;;  %v2654_v10 = vld [vmem:[#allocation3] ss:$8 sps:$4 sm:$0xff]   ;;  %v2655_v41 = vld [vmem:[#allocation3 + $0xf4] ss:$8 sps:$4 sm:$0xff]   ;;  %v2657_v39 = vld [vmem:[#allocation3 + $0xf0] ss:$8 sps:$4 sm:$0xff]  }
 0x3f2   :  { %2555 = vmatprep.subr.bf16.mxu0 %v2681_v44  ;;  %v2684_v7 = vld [vmem:[%s3856_s9 + $0x28] sm:$0xff]   ;;  %v2685_v8 = vld [vmem:[%s3856_s9 + $0x60] sm:$0xff]   ;;  %v2687_v5 = vld [vmem:[%s3856_s9 + $0x58] sm:$0xff]  }
 0x3f3   :  { %v2658_v9 = vld [vmem:[#allocation3 + $0xe4] ss:$8 sps:$4 sm:$0xff]   ;;  %v2660_v25 = vld [vmem:[#allocation3 + $0xe0] ss:$8 sps:$4 sm:$0xff]   ;;  %v2661_v6 = vld [vmem:[#allocation3 + $0xd4] ss:$8 sps:$4 sm:$0xff]  }
 0x3f4   :  { %2086 = vmatpush1.bf16.msra.mxu1 %v2639_v16  ;;  %v2686_v56 = vld [vmem:[%s3856_s9 + $0x20] sm:$0xff]   ;;  %v2688_v37 = vld [vmem:[%s3856_s9 + $0x18] sm:$0xff]   ;;  %v2689_v38 = vld [vmem:[%s3856_s9 + $0x50] sm:$0xff]  }
 0x3f5   :  { %2087 = vmatprep.subr.bf16.mxu1 %v2640_v47  ;;  %2556 = vmatpush3.bf16.msra.mxu0 %v2682_v24  ;;  %v2663_v21 = vld [vmem:[#allocation3 + $0xd0] ss:$8 sps:$4 sm:$0xff]   ;;  %v2664_v23 = vld [vmem:[#allocation3 + $0xc4] ss:$8 sps:$4 sm:$0xff]   ;;  %v2666_v4 = vld [vmem:[#allocation3 + $0xc0] ss:$8 sps:$4 sm:$0xff]  }
 0x3f6   :  { %2557 = vmatprep.subr.bf16.mxu0 %v2683_v40  ;;  %v2690_v3 = vld [vmem:[%s3856_s9 + $0x10] sm:$0xff]   ;;  %v2670_v54 = vld [vmem:[#allocation3 + $0xa4] ss:$8 sps:$4 sm:$0xff]   ;;  %v2672_v1 = vld [vmem:[#allocation3 + $0xa0] ss:$8 sps:$4 sm:$0xff]  }
 0x3f7   :  { %v2667_v35 = vld [vmem:[#allocation3 + $0xb4] ss:$8 sps:$4 sm:$0xff]   ;;  %v2669_v36 = vld [vmem:[#allocation3 + $0xb0] ss:$8 sps:$4 sm:$0xff]   ;;  %v2676_v55 = vld [vmem:[#allocation3 + $0x84] ss:$8 sps:$4 sm:$0xff]  }
 0x3f8   :  { %2088 = vmatpush1.bf16.msra.mxu1 %v2642_v48  ;;  %v2673_v33 = vld [vmem:[#allocation3 + $0x94] ss:$8 sps:$4 sm:$0xff]   ;;  %v2675_v34 = vld [vmem:[#allocation3 + $0x90] ss:$8 sps:$4 sm:$0xff]   ;;  %v2678_v42 = vld [vmem:[#allocation3 + $0x80] ss:$8 sps:$4 sm:$0xff]  }
 0x3f9   :  { %2089 = vmatprep.subr.bf16.mxu1 %v2643_v20  ;;  %2558 = vmatpush3.bf16.msra.mxu0 %v2684_v7  ;;  %v2691_v17 = vld [vmem:[%s3856_s9 + $0x48] sm:$0xff]   ;;  %v2693_v32 = vld [vmem:[%s3856_s9 + $0x40] sm:$0xff]   ;;  %v2514_v49 = vld [vmem:[#allocation7] ss:$0 sm:$0xff] }
 0x3fa   :  { %2559 = vmatprep.subr.bf16.mxu0 %v2685_v8  ;;  %v2692_v31 = vld [vmem:[%s3856_s9 + $0x8] sm:$0xff]   ;;  %v2694_v63 = vld [vmem:[%s3856_s9] sm:$0xff]  }
 0x3fb   :  { %v1909_v0 = vld [vmem:[%s3855_s8] sm:$0x3] }
 0x3fc   :  { %2090 = vmatpush1.bf16.msra.mxu1 %v2645_v18  ;;  %v1914_v58 = vrot.slane %v1909_v0, %v1036_v2  ;;  %v1918_v51 = vrot.slane %v1909_v0, %v1040_v22 }
 0x3fd   :  { %2091 = vmatprep.subr.bf16.mxu1 %v2646_v13  ;;  %2560 = vmatpush3.bf16.msra.mxu0 %v2686_v56 }
 0x3fe   :  { %2561 = vmatprep.subr.bf16.mxu0 %v2687_v5 }
 0x400   :  { %2092 = vmatpush1.bf16.msra.mxu1 %v2648_v14 }
 0x401   :  { %2093 = vmatprep.subr.bf16.mxu1 %v2649_v45  ;;  %2562 = vmatpush3.bf16.msra.mxu0 %v2688_v37 }
 0x402   :  { %2563 = vmatprep.subr.bf16.mxu0 %v2689_v38 }
 0x404   :  { %2094 = vmatpush1.bf16.msra.mxu1 %v2651_v46 }
 0x405   :  { %2095 = vmatprep.subr.bf16.mxu1 %v2652_v11  ;;  %2564 = vmatpush3.bf16.msra.mxu0 %v2690_v3 }
 0x406   :  { %2565 = vmatprep.subr.bf16.mxu0 %v2691_v17 }
 0x408   :  { %2096 = vmatpush1.bf16.msra.mxu1 %v2654_v10 }
 0x409   :  { %2097 = vmatprep.subr.bf16.mxu1 %v2655_v41  ;;  %2566 = vmatpush3.bf16.msra.mxu0 %v2692_v31 }
 0x40a   :  { %2567 = vmatprep.subr.bf16.mxu0 %v2693_v32 }
 0x40c   :  { %2098 = vmatpush2.bf16.msra.mxu1 %v2657_v39 }
 0x40d   :  { %2099 = vmatprep.subr.bf16.mxu1 %v2658_v9  ;;  %2568 = vmatpush3.bf16.msra.mxu0 %v2694_v63 }
 0x410   :  { %2100 = vmatpush2.bf16.msra.mxu1 %v2660_v25 }
 0x411   :  { %2101 = vmatprep.subr.bf16.mxu1 %v2661_v6 }
 0x414   :  { %2102 = vmatpush2.bf16.msra.mxu1 %v2663_v21 }
 0x415   :  { %2103 = vmatprep.subr.bf16.mxu1 %v2664_v23 }
 0x418   :  { %2104 = vmatpush2.bf16.msra.mxu1 %v2666_v4 }
 0x419   :  { %2105 = vmatprep.subr.bf16.mxu1 %v2667_v35 }
 0x41c   :  { %2106 = vmatpush2.bf16.msra.mxu1 %v2669_v36 }
 0x41d   :  { %2107 = vmatprep.subr.bf16.mxu1 %v2670_v54 }
 0x420   :  { %2108 = vmatpush2.bf16.msra.mxu1 %v2672_v1 }
 0x421   :  { %2109 = vmatprep.subr.bf16.mxu1 %v2673_v33 }
 0x424   :  { %2110 = vmatpush2.bf16.msra.mxu1 %v2675_v34 }
 0x425   :  { %2111 = vmatprep.subr.bf16.mxu1 %v2676_v55 }
 0x428   :  { %2112 = vmatpush2.bf16.msra.mxu1 %v2678_v42 }
 0x42b   :  { %2114 = vmatmul.mubr.bf16.vlgmr.msra.gmra.mxu1 %v3786_v29 }
 0x4eb   :  { %v2115_v52 = vpop.f32.mrf.mxu1 }
 0x4ec   :  { %v2116_v50 = vadd.f32 %v2115_v52, %v1914_v58 }
 0x4ed   :  { %v2117_v30 = vpop.f32.mrf.mxu1 }
 0x4ee   :  { %v2118_v57 = vadd.f32 %v2117_v30, %v1918_v51  ;;  %v2122_v28 = vmax.f32 %v2116_v50, 0.0 }
 0x4ef   :  { %v2119_v27 = vpop.f32.mrf.mxu1 }
 0x4f0   :  { %v2123_v19 = vmax.f32 %v2118_v57, 0.0  ;;  %v2124_v60 = vpack.c.bf16 %v2122_v28, %v2122_v28 }
 0x4f1   :  { %v2120_v29 = vpop.f32.mrf.mxu1 }
 0x4f2   :  { %v2125_v59 = vpack.c.bf16 %v2123_v19, %v2123_v19 }
 0x4f4   :  { %2293 = vmatprep.mubr.bf16.mxu0 %v2125_v59 }
 0x4f5   :  { %2294 = vmatmul.mubr.bf16.vlgmr.msra.gmra.mxu0 %v2124_v60 }
 0x5b5   :  { %v2569_v62 = vpop.f32.mrf.mxu0 }
 0x5b7   :  { %v2570_v26 = vpop.f32.mrf.mxu0 }
 0x5b8   :  { %v2571_v53 = vadd.f32 %v2570_v26, %v2569_v62 }
 0x5b9   :  { %v2572_v2 = vpop.f32.mrf.mxu0 }
 0x5ba   :  { %v2296_v61 = vadd.f32 %v2571_v53, %v2514_v49 }
 0x5bb   :  { %v2573_v22 = vpop.f32.mrf.mxu0 }
 0x5bc   :  { %2302 = vst.msk [vmem:[%s3858_s11] sm:$0x3] %vm2301_vm13, %v2296_v61 }
 0x5bd   :  { %2307 = vsyncpa [#allocation9], 1 }
 0x5be   :  { %2308 = vsyncpa [#allocation11], 1 }
 0x5bf   :  { %2309 = vsyncmov [#allocation6] }
 0x5c2   :  { %s2310_s20 = vpop.sfrf %2309 }
 0x5c3   :  { %p2531_p1 = scmp.ne.s32.totalorder %s2310_s20, 0 }
 0x5c5   :  { %2314 = shalt.err (%p2531_p1)  }
 0x5c6   :  { %2316 = vsyncmov [#allocation6 + $0x1] }
 0x5c9   :  { %s2317_s21 = vpop.sfrf %2316 }
 0x5ca   :  { %p2532_p2 = scmp.ne.s32.totalorder %s2317_s21, 0 }
 0x5cc   :  { %2321 = shalt.err (%p2532_p2)  }

</bundles_post_ra>
